<compile_context>
chip_gen: v7x
topology: tpu7x:2x2x1
jax: 0.10.0
libtpu: 0.0.40
codegen_flags: <defaults>
</compile_context>

<pallas_src>
import jax
import jax.numpy as jnp
import numpy as np
from jax.experimental import pallas as pl
from jax.experimental.pallas import tpu as pltpu

# Small, lane-aligned stand-ins for the original sizes (768 -> 128).
D = 128            # "BERT hidden" size (orig 768)
H1 = 128           # mlp1 hidden size   (orig 128)
OUT_PAD = 128      # final head padded from 1 -> 128 lanes (lane-dense store)
B = 2              # batch (entity-link pairs)
SQ = 8             # query sequence length
SC = 16            # candidate-abstract sequence length
BN_EPS = 1e-5      # PyTorch BatchNorm1d default
PREC = jax.lax.Precision.HIGHEST

assert D == H1 == OUT_PAD, "weight-stack packing assumes D == H1 == OUT_PAD"


def _entity_link_kernel(pos_ref, xq_ref, xc_ref, wstack_ref, vecs_ref, out_ref):
    # wstack rows: 0=Wspan_start 1=Wspan_end 2=W1_prod 3=W1_diff 4=W2_pad  (each (D,128))
    # vecs rows:   0=attn wa     1=b_span    2=w1_dot  3=b1_fold 4=b2_pad  (each (128,))
    xq = xq_ref[...]                                   # (B, SQ, D) f32
    xc = xc_ref[...]                                   # (B, SC, D) f32

    # ---- Attention pooling over candidate abstract (no mask on this path) ----
    # NOTE: at production F/S sizes express these as MXU einsums; at toy sizes
    # the VPU multiply + reduce is negligible and lowers robustly.
    wa = vecs_ref[0:1, :]                              # (1, D)
    eij = jnp.tanh(jnp.sum(xc * wa[None, :, :], axis=-1))          # (B, SC)
    a = jnp.exp(eij)
    a = a / jnp.sum(a, axis=1, keepdims=True) + 1e-10
    cand = jnp.sum(xc * a[:, :, None], axis=1)                      # (B, D)

    # ---- EndpointSpanExtractor via one-hot select (no dynamic sublane slice) --
    pos = pos_ref[...]                                              # (B, 2) int32
    iota = jax.lax.broadcasted_iota(jnp.int32, (B, SQ), 1)          # (B, SQ)
    oh_s = (iota == pos[:, 0:1]).astype(jnp.float32)                # (B, SQ)
    oh_e = (iota == pos[:, 1:2]).astype(jnp.float32)
    h_s = jnp.sum(xq * oh_s[:, :, None], axis=1)                    # (B, D)
    h_e = jnp.sum(xq * oh_e[:, :, None], axis=1)                    # (B, D)

    # ---- span_linear(concat(h_s, h_e)) without materializing the 2D concat ---
    spans = (jnp.dot(h_s, wstack_ref[0], precision=PREC,
                     preferred_element_type=jnp.float32)
             + jnp.dot(h_e, wstack_ref[1], precision=PREC,
                       preferred_element_type=jnp.float32)
             + vecs_ref[1:2, :])                                    # (B, D)

    # ---- relation vector pieces (concat never materialized) ------------------
    prod = cand * spans                                             # (B, D)
    diff = cand - spans                                             # (B, D)
    dotp = jnp.sum(prod, axis=-1, keepdims=True)                    # (B, 1)

    # ---- mlp1 = BN1 (folded) + Linear(2D+1 -> H1) + ReLU ----------------------
    h1 = (jnp.dot(prod, wstack_ref[2], precision=PREC,
                  preferred_element_type=jnp.float32)
          + jnp.dot(diff, wstack_ref[3], precision=PREC,
                    preferred_element_type=jnp.float32)
          + dotp * vecs_ref[2:3, :]
          + vecs_ref[3:4, :])                                       # (B, H1)
    h1 = jnp.maximum(h1, 0.0)

    # ---- mlp2 = BN2 (folded) + Linear(H1 -> 1, zero-padded to 128) + Sigmoid --
    z2 = (jnp.dot(h1, wstack_ref[4], precision=PREC,
                  preferred_element_type=jnp.float32)
          + vecs_ref[4:5, :])                                       # (B, 128)
    out_ref[...] = 1.0 / (1.0 + jnp.exp(-z2))        # lane-dense store; col 0 is the output


def entity_link_forward(pos, xq, xc, params):
    (wa, wspan, bspan,
     g1, bt1, mu1, var1, w1, b1,
     g2, bt2, mu2, var2, w2, b2) = params

    # --- fold BatchNorm1d (eval) into the following Linear layers (host side) ---
    scale1 = g1 / jnp.sqrt(var1 + BN_EPS)              # (2D+1,)
    shift1 = bt1 - mu1 * scale1
    w1f = w1 * scale1[:, None]                         # (2D+1, H1)
    b1f = b1 + shift1 @ w1                             # (H1,)

    scale2 = g2 / jnp.sqrt(var2 + BN_EPS)              # (H1,)
    shift2 = bt2 - mu2 * scale2
    w2f = w2 * scale2[:, None]                         # (H1, 1)
    b2f = b2 + shift2 @ w2                             # (1,)

    # --- pad the 1-wide head to 128 lanes for an unmasked store ---
    w2p = jnp.zeros((H1, OUT_PAD), jnp.float32).at[:, 0].set(w2f[:, 0])
    b2p = jnp.zeros((OUT_PAD,), jnp.float32).at[0].set(b2f[0])

    # --- pack params into two VMEM operands (cuts DMA/operand overhead) ---
    wstack = jnp.stack([wspan[:D], wspan[D:], w1f[:D], w1f[D:2 * D], w2p], axis=0)
    vecs = jnp.stack([wa[:, 0], bspan, w1f[2 * D], b1f, b2p], axis=0)

    vmem = pl.BlockSpec(memory_space=pltpu.MemorySpace.VMEM)
    out = pl.pallas_call(
        _entity_link_kernel,
        out_shape=jax.ShapeDtypeStruct((B, OUT_PAD), jnp.float32),
        in_specs=[vmem] * 5,
        out_specs=vmem,
    )(pos, xq, xc, wstack, vecs)
    return out[:, 0:1]                                 # (B, 1), matches the PyTorch output


def reference(pos, xq, xc, params):
    """Pure-JAX reference mirroring EntityLink_v2.forward (eval mode)."""
    (wa, wspan, bspan,
     g1, bt1, mu1, var1, w1, b1,
     g2, bt2, mu2, var2, w2, b2) = params

    # Attention pooling (no mask on this call path).
    eij = jnp.tanh(jnp.dot(xc.reshape(-1, D), wa, precision=PREC).reshape(B, SC))
    a = jnp.exp(eij)
    a = a / jnp.sum(a, axis=1, keepdims=True) + 1e-10
    cand = jnp.sum(xc * a[:, :, None], axis=1)

    # EndpointSpanExtractor + span_linear.
    hs = xq[jnp.arange(B), pos[:, 0]]
    he = xq[jnp.arange(B), pos[:, 1]]
    spans = jnp.dot(jnp.concatenate([hs, he], axis=-1), wspan, precision=PREC) + bspan

    rel = jnp.concatenate(
        [cand * spans, cand - spans,
         jnp.sum(cand * spans, axis=-1, keepdims=True)], axis=-1)   # (B, 2D+1)

    y1 = (rel - mu1) / jnp.sqrt(var1 + BN_EPS) * g1 + bt1
    h1 = jnp.maximum(jnp.dot(y1, w1, precision=PREC) + b1, 0.0)
    y2 = (h1 - mu2) / jnp.sqrt(var2 + BN_EPS) * g2 + bt2
    return jax.nn.sigmoid(jnp.dot(y2, w2, precision=PREC) + b2)     # (B, 1)


def init_params(key):
    ks = jax.random.split(key, 15)
    # Attention weight: xavier_uniform on (D, 1).
    ba = float(np.sqrt(6.0 / (D + 1)))
    wa = jax.random.uniform(ks[0], (D, 1), jnp.float32, -ba, ba)
    # span_linear: Linear(2D -> D)
    bs = 1.0 / np.sqrt(2 * D)
    wspan = jax.random.uniform(ks[1], (2 * D, D), jnp.float32, -bs, bs)
    bspan = jax.random.uniform(ks[2], (D,), jnp.float32, -bs, bs)
    # mlp1: BatchNorm1d(2D+1) + Linear(2D+1 -> H1)
    g1 = jax.random.uniform(ks[3], (2 * D + 1,), jnp.float32, 0.5, 1.5)
    bt1 = 0.1 * jax.random.normal(ks[4], (2 * D + 1,), jnp.float32)
    mu1 = 0.1 * jax.random.normal(ks[5], (2 * D + 1,), jnp.float32)
    var1 = jax.random.uniform(ks[6], (2 * D + 1,), jnp.float32, 0.5, 1.5)
    b1u = 1.0 / np.sqrt(2 * D + 1)
    w1 = jax.random.uniform(ks[7], (2 * D + 1, H1), jnp.float32, -b1u, b1u)
    b1 = jax.random.uniform(ks[8], (H1,), jnp.float32, -b1u, b1u)
    # mlp2: BatchNorm1d(H1) + Linear(H1 -> 1)
    g2 = jax.random.uniform(ks[9], (H1,), jnp.float32, 0.5, 1.5)
    bt2 = 0.1 * jax.random.normal(ks[10], (H1,), jnp.float32)
    mu2 = 0.1 * jax.random.normal(ks[11], (H1,), jnp.float32)
    var2 = jax.random.uniform(ks[12], (H1,), jnp.float32, 0.5, 1.5)
    b2u = 1.0 / np.sqrt(H1)
    w2 = jax.random.uniform(ks[13], (H1, 1), jnp.float32, -b2u, b2u)
    b2 = jax.random.uniform(ks[14], (1,), jnp.float32, -b2u, b2u)
    return (wa, wspan, bspan, g1, bt1, mu1, var1, w1, b1,
            g2, bt2, mu2, var2, w2, b2)


if __name__ == "__main__":
    key = jax.random.PRNGKey(0)
    kq, kc, kp = jax.random.split(key, 3)

    # Synthetic "BERT" token features (stand-in for the external encoder).
    xq = jax.random.normal(kq, (B, SQ, D), jnp.float32)   # query last-layer outputs
    xc = jax.random.normal(kc, (B, SC, D), jnp.float32)   # candidate-abstract outputs

    pos = jnp.array([[1, 5], [0, 7]], dtype=jnp.int32)    # (B, 2) span endpoints

    params = init_params(kp)

    out = entity_link_forward(pos, xq, xc, params)
    jax.block_until_ready(out)

    ref = reference(pos, xq, xc, params)
    np.testing.assert_allclose(np.asarray(out), np.asarray(ref), rtol=1e-4, atol=1e-4)

    print("KERNEL_OK")
</pallas_src>

<mosaic_0001>
module attributes {stable_mosaic.version = 11 : i64} {
  func.func @_entity_link_kernel(%arg0: memref<2x2xi32, #tpu.memory_space<vmem>>, %arg1: memref<2x8x128xf32, #tpu.memory_space<vmem>>, %arg2: memref<2x16x128xf32, #tpu.memory_space<vmem>>, %arg3: memref<5x128x128xf32, #tpu.memory_space<vmem>>, %arg4: memref<5x128xf32, #tpu.memory_space<vmem>>, %arg5: memref<2x128xf32, #tpu.memory_space<vmem>>) attributes {dimension_semantics = [], scalar_prefetch = 0 : i64, scratch_operands = 0 : i64, tpu.core_type = #tpu.core_type<tc>} {
    %c0 = arith.constant 0 : index
    %c0_0 = arith.constant 0 : index
    %c0_1 = arith.constant 0 : index
    %0 = vector.load %arg1[%c0, %c0_0, %c0_1] : memref<2x8x128xf32, #tpu.memory_space<vmem>>, vector<2x8x128xf32>
    %c0_2 = arith.constant 0 : index
    %c0_3 = arith.constant 0 : index
    %c0_4 = arith.constant 0 : index
    %1 = vector.load %arg2[%c0_2, %c0_3, %c0_4] : memref<2x16x128xf32, #tpu.memory_space<vmem>>, vector<2x16x128xf32>
    %c0_5 = arith.constant 0 : index
    %c0_6 = arith.constant 0 : index
    %2 = vector.load %arg4[%c0_5, %c0_6] : memref<5x128xf32, #tpu.memory_space<vmem>>, vector<1x128xf32>
    %3 = vector.shape_cast %2 : vector<1x128xf32> to vector<1x1x128xf32>
    %4 = vector.broadcast %3 : vector<1x1x128xf32> to vector<2x16x128xf32>
    %5 = arith.mulf %1, %4 : vector<2x16x128xf32>
    %cst = arith.constant dense<0.000000e+00> : vector<2x16xf32>
    %6 = vector.multi_reduction <add>, %5, %cst [2] : vector<2x16x128xf32> to vector<2x16xf32>
    %7 = math.tanh %6 : vector<2x16xf32>
    %8 = math.exp %7 : vector<2x16xf32>
    %cst_7 = arith.constant dense<0.000000e+00> : vector<2xf32>
    %9 = vector.multi_reduction <add>, %8, %cst_7 [1] : vector<2x16xf32> to vector<2xf32>
    %10 = vector.shape_cast %9 : vector<2xf32> to vector<2x1xf32>
    %11 = vector.broadcast %10 : vector<2x1xf32> to vector<2x16xf32>
    %12 = arith.divf %8, %11 : vector<2x16xf32>
    %cst_8 = arith.constant 1.000000e-10 : f32
    %13 = vector.broadcast %cst_8 : f32 to vector<2x16xf32>
    %14 = arith.addf %12, %13 : vector<2x16xf32>
    %15 = vector.shape_cast %14 : vector<2x16xf32> to vector<2x16x1xf32>
    %16 = vector.broadcast %15 : vector<2x16x1xf32> to vector<2x16x128xf32>
    %17 = arith.mulf %1, %16 : vector<2x16x128xf32>
    %cst_9 = arith.constant dense<0.000000e+00> : vector<2x128xf32>
    %18 = vector.multi_reduction <add>, %17, %cst_9 [1] : vector<2x16x128xf32> to vector<2x128xf32>
    %c0_10 = arith.constant 0 : index
    %c0_11 = arith.constant 0 : index
    %19 = vector.load %arg0[%c0_10, %c0_11] : memref<2x2xi32, #tpu.memory_space<vmem>>, vector<2x2xi32>
    %20 = tpu.iota {dimensions = array<i32: 1>} : vector<2x8xi32>
    %21 = vector.extract_strided_slice %19 {offsets = [0, 0], sizes = [2, 1], strides = [1, 1]} : vector<2x2xi32> to vector<2x1xi32>
    %22 = vector.broadcast %21 : vector<2x1xi32> to vector<2x8xi32>
    %23 = arith.cmpi eq, %20, %22 : vector<2x8xi32>
    %24 = arith.extui %23 : vector<2x8xi1> to vector<2x8xi32>
    %25 = arith.sitofp %24 : vector<2x8xi32> to vector<2x8xf32>
    %26 = vector.extract_strided_slice %19 {offsets = [0, 1], sizes = [2, 1], strides = [1, 1]} : vector<2x2xi32> to vector<2x1xi32>
    %27 = vector.broadcast %26 : vector<2x1xi32> to vector<2x8xi32>
    %28 = arith.cmpi eq, %20, %27 : vector<2x8xi32>
    %29 = arith.extui %28 : vector<2x8xi1> to vector<2x8xi32>
    %30 = arith.sitofp %29 : vector<2x8xi32> to vector<2x8xf32>
    %31 = vector.shape_cast %25 : vector<2x8xf32> to vector<2x8x1xf32>
    %32 = vector.broadcast %31 : vector<2x8x1xf32> to vector<2x8x128xf32>
    %33 = arith.mulf %0, %32 : vector<2x8x128xf32>
    %cst_12 = arith.constant dense<0.000000e+00> : vector<2x128xf32>
    %34 = vector.multi_reduction <add>, %33, %cst_12 [1] : vector<2x8x128xf32> to vector<2x128xf32>
    %35 = vector.shape_cast %30 : vector<2x8xf32> to vector<2x8x1xf32>
    %36 = vector.broadcast %35 : vector<2x8x1xf32> to vector<2x8x128xf32>
    %37 = arith.mulf %0, %36 : vector<2x8x128xf32>
    %cst_13 = arith.constant dense<0.000000e+00> : vector<2x128xf32>
    %38 = vector.multi_reduction <add>, %37, %cst_13 [1] : vector<2x8x128xf32> to vector<2x128xf32>
    %c0_14 = arith.constant 0 : index
    %c0_15 = arith.constant 0 : index
    %c0_16 = arith.constant 0 : index
    %39 = vector.load %arg3[%c0_14, %c0_15, %c0_16] : memref<5x128x128xf32, #tpu.memory_space<vmem>>, vector<1x128x128xf32>
    %40 = vector.shape_cast %39 : vector<1x128x128xf32> to vector<128x128xf32>
    %cst_17 = arith.constant dense<0.000000e+00> : vector<2x128xf32>
    %41 = tpu.matmul %34, %40, %cst_17 {dimension_numbers = #tpu.dot_dimension_numbers<[1], [0], [0], [1], [0, 0, 1, 1], [], []>, precision = #tpu.contract_precision<fp32>} : vector<2x128xf32>, vector<128x128xf32>, vector<2x128xf32> -> vector<2x128xf32>
    %c1 = arith.constant 1 : index
    %c0_18 = arith.constant 0 : index
    %c0_19 = arith.constant 0 : index
    %42 = vector.load %arg3[%c1, %c0_18, %c0_19] : memref<5x128x128xf32, #tpu.memory_space<vmem>>, vector<1x128x128xf32>
    %43 = vector.shape_cast %42 : vector<1x128x128xf32> to vector<128x128xf32>
    %cst_20 = arith.constant dense<0.000000e+00> : vector<2x128xf32>
    %44 = tpu.matmul %38, %43, %cst_20 {dimension_numbers = #tpu.dot_dimension_numbers<[1], [0], [0], [1], [0, 0, 1, 1], [], []>, precision = #tpu.contract_precision<fp32>} : vector<2x128xf32>, vector<128x128xf32>, vector<2x128xf32> -> vector<2x128xf32>
    %45 = arith.addf %41, %44 : vector<2x128xf32>
    %c1_21 = arith.constant 1 : index
    %c0_22 = arith.constant 0 : index
    %46 = vector.load %arg4[%c1_21, %c0_22] : memref<5x128xf32, #tpu.memory_space<vmem>>, vector<1x128xf32>
    %47 = vector.broadcast %46 : vector<1x128xf32> to vector<2x128xf32>
    %48 = arith.addf %45, %47 : vector<2x128xf32>
    %49 = arith.mulf %18, %48 : vector<2x128xf32>
    %50 = arith.subf %18, %48 : vector<2x128xf32>
    %cst_23 = arith.constant dense<0.000000e+00> : vector<2xf32>
    %51 = vector.multi_reduction <add>, %49, %cst_23 [1] : vector<2x128xf32> to vector<2xf32>
    %52 = vector.shape_cast %51 : vector<2xf32> to vector<2x1xf32>
    %c2 = arith.constant 2 : index
    %c0_24 = arith.constant 0 : index
    %c0_25 = arith.constant 0 : index
    %53 = vector.load %arg3[%c2, %c0_24, %c0_25] : memref<5x128x128xf32, #tpu.memory_space<vmem>>, vector<1x128x128xf32>
    %54 = vector.shape_cast %53 : vector<1x128x128xf32> to vector<128x128xf32>
    %cst_26 = arith.constant dense<0.000000e+00> : vector<2x128xf32>
    %55 = tpu.matmul %49, %54, %cst_26 {dimension_numbers = #tpu.dot_dimension_numbers<[1], [0], [0], [1], [0, 0, 1, 1], [], []>, precision = #tpu.contract_precision<fp32>} : vector<2x128xf32>, vector<128x128xf32>, vector<2x128xf32> -> vector<2x128xf32>
    %c3 = arith.constant 3 : index
    %c0_27 = arith.constant 0 : index
    %c0_28 = arith.constant 0 : index
    %56 = vector.load %arg3[%c3, %c0_27, %c0_28] : memref<5x128x128xf32, #tpu.memory_space<vmem>>, vector<1x128x128xf32>
    %57 = vector.shape_cast %56 : vector<1x128x128xf32> to vector<128x128xf32>
    %cst_29 = arith.constant dense<0.000000e+00> : vector<2x128xf32>
    %58 = tpu.matmul %50, %57, %cst_29 {dimension_numbers = #tpu.dot_dimension_numbers<[1], [0], [0], [1], [0, 0, 1, 1], [], []>, precision = #tpu.contract_precision<fp32>} : vector<2x128xf32>, vector<128x128xf32>, vector<2x128xf32> -> vector<2x128xf32>
    %59 = arith.addf %55, %58 : vector<2x128xf32>
    %c2_30 = arith.constant 2 : index
    %c0_31 = arith.constant 0 : index
    %60 = vector.load %arg4[%c2_30, %c0_31] : memref<5x128xf32, #tpu.memory_space<vmem>>, vector<1x128xf32>
    %61 = vector.broadcast %52 : vector<2x1xf32> to vector<2x128xf32>
    %62 = vector.broadcast %60 : vector<1x128xf32> to vector<2x128xf32>
    %63 = arith.mulf %61, %62 : vector<2x128xf32>
    %64 = arith.addf %59, %63 : vector<2x128xf32>
    %c3_32 = arith.constant 3 : index
    %c0_33 = arith.constant 0 : index
    %65 = vector.load %arg4[%c3_32, %c0_33] : memref<5x128xf32, #tpu.memory_space<vmem>>, vector<1x128xf32>
    %66 = vector.broadcast %65 : vector<1x128xf32> to vector<2x128xf32>
    %67 = arith.addf %64, %66 : vector<2x128xf32>
    %cst_34 = arith.constant 0.000000e+00 : f32
    %68 = vector.broadcast %cst_34 : f32 to vector<2x128xf32>
    %69 = arith.maximumf %67, %68 : vector<2x128xf32>
    %c4 = arith.constant 4 : index
    %c0_35 = arith.constant 0 : index
    %c0_36 = arith.constant 0 : index
    %70 = vector.load %arg3[%c4, %c0_35, %c0_36] : memref<5x128x128xf32, #tpu.memory_space<vmem>>, vector<1x128x128xf32>
    %71 = vector.shape_cast %70 : vector<1x128x128xf32> to vector<128x128xf32>
    %cst_37 = arith.constant dense<0.000000e+00> : vector<2x128xf32>
    %72 = tpu.matmul %69, %71, %cst_37 {dimension_numbers = #tpu.dot_dimension_numbers<[1], [0], [0], [1], [0, 0, 1, 1], [], []>, precision = #tpu.contract_precision<fp32>} : vector<2x128xf32>, vector<128x128xf32>, vector<2x128xf32> -> vector<2x128xf32>
    %c4_38 = arith.constant 4 : index
    %c0_39 = arith.constant 0 : index
    %73 = vector.load %arg4[%c4_38, %c0_39] : memref<5x128xf32, #tpu.memory_space<vmem>>, vector<1x128xf32>
    %74 = vector.broadcast %73 : vector<1x128xf32> to vector<2x128xf32>
    %75 = arith.addf %72, %74 : vector<2x128xf32>
    %cst_40 = arith.constant 0.000000e+00 : f32
    %76 = vector.broadcast %cst_40 : f32 to vector<2x128xf32>
    %77 = arith.subf %76, %75 : vector<2x128xf32>
    %78 = math.exp %77 : vector<2x128xf32>
    %cst_41 = arith.constant 1.000000e+00 : f32
    %79 = vector.broadcast %cst_41 : f32 to vector<2x128xf32>
    %80 = arith.addf %79, %78 : vector<2x128xf32>
    %cst_42 = arith.constant 1.000000e+00 : f32
    %81 = vector.broadcast %cst_42 : f32 to vector<2x128xf32>
    %82 = arith.divf %81, %80 : vector<2x128xf32>
    %c0_43 = arith.constant 0 : index
    %c0_44 = arith.constant 0 : index
    %83 = vector.load %arg5[%c0_43, %c0_44] : memref<2x128xf32, #tpu.memory_space<vmem>>, vector<2x128xf32>
    tpu.vector_store %arg5[%c0_43, %c0_44], %82 {strides = array<i32>} : memref<2x128xf32, #tpu.memory_space<vmem>>, vector<2x128xf32>,
    return
  }
}

</mosaic_0001>

<bundles_post_ra>
// kernel: tpu_custom_call.1
= control target key start
LH: loop header
LB: loop body
LE: loop exit
PB: predicated region body
PF: predicated region fallthrough
CT: control target
= control target key end

     0   :  { %10 = vsyncpa [#allocation3], 0  ;;  %s7896_s0 = inlined_call_operand.hbm [shape: s32[2,2], index: 0, kind: input, shape index: {}]   ;;  %s7897_s1 = inlined_call_operand.hbm [shape: f32[2,8,128], index: 1, kind: input, shape index: {}]   ;;  %s7898_s2 = inlined_call_operand.hbm [shape: f32[2,16,128], index: 2, kind: input, shape index: {}]   ;;  %s7899_s3 = inlined_call_operand.hbm [shape: f32[5,128,128], index: 3, kind: input, shape index: {}]   ;;  %s7900_s4 = inlined_call_operand.vmem [shape: f32[5,128], index: 4, kind: input, shape index: {}]   ;;  %s7901_s5 = inlined_call_operand.hbm [shape: f32[2,128], index: 5, kind: output, shape index: {}]  }
   0x1   :  { %11 = vsyncpa [#allocation6], 0 }
   0x2   :  { %12 = vsyncpa [#allocation9], 0 }
   0x3   :  { %13 = vsyncpa [#allocation4], 0  ;;  %s6098_s18 = smov [#allocation5]   ;;  %s5980_s22 = scalar_lea.hbm %s7897_s1, 256 }
   0x4   :  { %s29_s19 = sshll.u32 %s6098_s18, 4  ;;  %p5981_p0 = scmp.ne.s32.totalorder %s7897_s1, %s5980_s22  ;;  %s30_s19 = int_to_ptr.vmem [resolvable:$true] %s29_s19 }
   0x5   :  { %p5984_p1 = scmp.lt.u32.totalorder %s5980_s22, %s7897_s1 }
   0x7   :  { %p5986_p2 = pnand %p5984_p1, %p5981_p0 }
   0x9   :  { %5989 = shalt.err (!%p5986_p2)
}
   0xa   :  { %s5990_s27 = scalar_lea.vmem %s30_s19, 256  ;;  %p5995_p4 = scmp.lt.s32.totalorder %s30_s19, %s30_s19 }
   0xb   :  { %p5991_p3 = scmp.ne.s32.totalorder %s30_s19, %s5990_s27  ;;  %p5996_p5 = scmp.lt.s32.totalorder %s5990_s27, %s5990_s27 }
   0xd   :  { %p5997_p6 = por %p5996_p5, %p5995_p4 }
   0xf   :  { %p5998_p7 = pnand %p5997_p6, %p5991_p3 }
  0x11   :  { %6001 = shalt.err (!%p5998_p7)
}
  0x12   :  { %s6099_s28 = smov 128   ;;  %s6100_s29 = smov 8  }
  0x13   :  { %35 = dma.hbm_to_vmem [thread:$0]  %s7897_s1, 256, %s30_s19, [#allocation6], %s6099_s28, %s6099_s28, %s6100_s29  }
  0x14   :  { %s6101_s7 = smov [#allocation2]   ;;  %s6102_s9 = smov [#allocation7]  }
  0x15   :  { %s20_s8 = sshll.u32 %s6101_s7, 4  ;;  %s41_s10 = sshll.u32 %s6102_s9, 4  ;;  %s21_s8 = int_to_ptr.vmem [resolvable:$true] %s20_s8  ;;  %s42_s10 = int_to_ptr.vmem [resolvable:$true] %s41_s10 }
  0x16   :  { %s6002_s13 = scalar_lea.hbm %s7896_s0, 32 }
  0x17   :  { %p6003_p8 = scmp.ne.s32.totalorder %s7896_s0, %s6002_s13  ;;  %p6006_p9 = scmp.lt.u32.totalorder %s6002_s13, %s7896_s0 }
  0x19   :  { %p6008_p10 = pnand %p6006_p9, %p6003_p8 }
  0x1b   :  { %6011 = shalt.err (!%p6008_p10)
}
  0x1c   :  { %s6012_s1 = scalar_lea.vmem %s21_s8, 32  ;;  %p6017_p12 = scmp.lt.s32.totalorder %s21_s8, %s21_s8 }
  0x1d   :  { %p6013_p11 = scmp.ne.s32.totalorder %s21_s8, %s6012_s1  ;;  %p6018_p13 = scmp.lt.s32.totalorder %s6012_s1, %s6012_s1 }
  0x1f   :  { %p6019_p0 = por %p6018_p13, %p6017_p12 }
  0x21   :  { %p6020_p1 = pnand %p6019_p0, %p6013_p11 }
  0x23   :  { %6023 = shalt.err (!%p6020_p1)
}
  0x24   :  { %23 = dma.hbm_to_vmem [thread:$0]  %s7896_s0, 32, %s21_s8, [#allocation3]  }
  0x25   :  { %s6024_s22 = scalar_lea.hbm %s7898_s2, 512 }
  0x26   :  { %p6025_p2 = scmp.ne.s32.totalorder %s7898_s2, %s6024_s22  ;;  %p6028_p3 = scmp.lt.u32.totalorder %s6024_s22, %s7898_s2 }
  0x28   :  { %p6030_p4 = pnand %p6028_p3, %p6025_p2 }
  0x2a   :  { %6033 = shalt.err (!%p6030_p4)
}
  0x2b   :  { %s6034_s27 = scalar_lea.vmem %s42_s10, 512  ;;  %p6039_p6 = scmp.lt.s32.totalorder %s42_s10, %s42_s10 }
  0x2c   :  { %p6035_p5 = scmp.ne.s32.totalorder %s42_s10, %s6034_s27  ;;  %p6040_p7 = scmp.lt.s32.totalorder %s6034_s27, %s6034_s27 }
  0x2e   :  { %p6041_p8 = por %p6040_p7, %p6039_p6 }
  0x30   :  { %p6042_p9 = pnand %p6041_p8, %p6035_p5 }
  0x32   :  { %6045 = shalt.err (!%p6042_p9)
}
  0x33   :  { %47 = dma.hbm_to_vmem [thread:$0]  %s7898_s2, 512, %s42_s10, [#allocation6], %s6099_s28, %s6099_s28, %s6100_s29  }
  0x34   :  { %s6103_s6 = smov [#allocation8]   ;;  %s6046_s11 = scalar_lea.hbm %s7899_s3, 10240 }
  0x35   :  { %s53_s7 = sshll.u32 %s6103_s6, 4  ;;  %p6047_p10 = scmp.ne.s32.totalorder %s7899_s3, %s6046_s11  ;;  %s54_s7 = int_to_ptr.vmem [resolvable:$true] %s53_s7 }
  0x36   :  { %p6050_p11 = scmp.lt.u32.totalorder %s6046_s11, %s7899_s3 }
  0x38   :  { %p6052_p12 = pnand %p6050_p11, %p6047_p10 }
  0x3a   :  { %6055 = shalt.err (!%p6052_p12)
}
  0x3b   :  { %s6056_s16 = scalar_lea.vmem %s54_s7, 10240  ;;  %p6061_p0 = scmp.lt.s32.totalorder %s54_s7, %s54_s7 }
  0x3c   :  { %p6057_p13 = scmp.ne.s32.totalorder %s54_s7, %s6056_s16  ;;  %p6062_p1 = scmp.lt.s32.totalorder %s6056_s16, %s6056_s16 }
  0x3e   :  { %p6063_p2 = por %p6062_p1, %p6061_p0 }
  0x40   :  { %p6064_p3 = pnand %p6063_p2, %p6057_p13 }
  0x42   :  { %6067 = shalt.err (!%p6064_p3)
}
  0x43   :  { %59 = dma.hbm_to_vmem [thread:$0]  %s7899_s3, 10240, %s54_s7, [#allocation9], %s6099_s28, %s6099_s28, %s6100_s29  }
  0x44   :  { %6090 = dma.done.wait [#allocation3], 32  }
  0x45   :  { %6091 = vsyncadd [#allocation3], 4294967264 }
  0x46   :  { %6092 = dma.done.wait [#allocation6], 768  }
  0x47   :  { %6093 = vsyncadd [#allocation6], 4294966528 }
  0x48   :  { %6094 = dma.done.wait [#allocation9], 10240  }
  0x49   :  { %6095 = vsyncadd [#allocation9], 4294957056  ;;  %v7902_v0 = vmov 1   ;;  %v6198_v1 = vld [vmem:[#allocation2] sm:$0x3]  ;;  %v6105_v2 = vmov 0   ;;  %v113_v22 = vlaneseq }
  0x4a   :  { %5948 = vset.pattern.permute.xlu0 %v7902_v0  ;;  %5949 = vset.pattern.permute.xlu1 %v6105_v2  ;;  %v287_v3 = vld [vmem:[#allocation8 + $0x80] sm:$0xff]  ;;  %v288_v4 = vld [vmem:[#allocation8 + $0x88] sm:$0xff]  ;;  %v289_v5 = vld [vmem:[#allocation8 + $0x90] sm:$0xff]  ;;  %v7937_v6 = vmov 0.0|0.0   ;;  %v7919_v43 = vmov 0.0   ;;  %vm6108_vm1 = vmmov 0  }
  0x4b   :  { %209 = vperm.xlu0 %5948, %v6198_v1   ;;  %5205 = vmatprep.subr.bf16.mxu1 %v7937_v6  ;;  %v308_v7 = vand.u32 4294901760, %v287_v3  ;;  %v311_v8 = vand.u32 4294901760, %v288_v4  ;;  %v290_v9 = vld [vmem:[#allocation8 + $0x98] sm:$0xff]  ;;  %v314_v10 = vand.u32 4294901760, %v289_v5  ;;  %v291_v18 = vld [vmem:[#allocation8 + $0xa0] sm:$0xff]  ;;  %v292_v19 = vld [vmem:[#allocation8 + $0xa8] sm:$0xff] }
  0x4c   :  { %5349 = vmatprep.subr.bf16.mxu0 %v7937_v6  ;;  %v317_v11 = vand.u32 4294901760, %v290_v9  ;;  %v320_v20 = vand.u32 4294901760, %v291_v18  ;;  %v323_v21 = vand.u32 4294901760, %v292_v19  ;;  %v293_v24 = vld [vmem:[#allocation8 + $0xb0] sm:$0xff]  ;;  %v294_v25 = vld [vmem:[#allocation8 + $0xb8] sm:$0xff]  ;;  %v6223_v28 = vshrl.u32 %v113_v22, 7  ;;  %4187 = vmatprep.mubr.msk.f32.mxu1 %vm6108_vm1, %v7919_v43 }
  0x4d   :  { %v6203_v12 = vpack.c.bf16 %v311_v8, %v308_v7  ;;  %v6205_v13 = vsub.f32 %v287_v3, %v308_v7  ;;  %v6207_v14 = vsub.f32 %v288_v4, %v311_v8  ;;  %v6209_v15 = vsub.f32 %v289_v5, %v314_v10  ;;  %v295_v30 = vld [vmem:[#allocation8 + $0xc0] sm:$0xff]  ;;  %v296_v31 = vld [vmem:[#allocation8 + $0xc8] sm:$0xff]  ;;  %v297_v39 = vld [vmem:[#allocation8 + $0xd0] sm:$0xff]  ;;  %4397 = vmatprep.mubr.msk.f32.mxu0 %vm6108_vm1, %v7919_v43  ;;  %s6109_s23 = smov [#allocation10]  }
  0x4e   :  { %v6211_v16 = vsub.f32 %v290_v9, %v317_v11  ;;  %v6214_v17 = vpack.c.bf16 %v317_v11, %v314_v10  ;;  %v6219_v23 = vpack.c.bf16 %v323_v21, %v320_v20  ;;  %v326_v26 = vand.u32 4294901760, %v293_v24  ;;  %7981 = vst [vmem:[#allocation15_spill] sm:$0xff] %v6223_v28  ;;  %v298_v40 = vld [vmem:[#allocation8 + $0xd8] sm:$0xff]  ;;  %v299_v52 = vld [vmem:[#allocation8 + $0xe0] sm:$0xff]  ;;  %v300_v53 = vld [vmem:[#allocation8 + $0xe8] sm:$0xff]  ;;  %s3627_s24 = sshll.u32 %s6109_s23, 4  ;;  %s3628_s24 = int_to_ptr.vmem [resolvable:$true] %s3627_s24 }
  0x4f   :  { %5950 = vset.pattern.permute.xlu0 %v6105_v2  ;;  %5207 = vmatpush3.bf16.msra.mxu1 %v6203_v12  ;;  %v329_v27 = vand.u32 4294901760, %v294_v25  ;;  %v6227_v32 = vand.u32 127, %v113_v22  ;;  %v332_v33 = vand.u32 4294901760, %v295_v30  ;;  %v335_v34 = vand.u32 4294901760, %v296_v31  ;;  %v301_v61 = vld [vmem:[#allocation8 + $0xf0] sm:$0xff]  ;;  %v302_v62 = vld [vmem:[#allocation8 + $0xf8] sm:$0xff]  ;;  %p6073_p5 = scmp.lt.s32.totalorder %s3628_s24, %s3628_s24 }
  0x50   :  { %5208 = vmatprep.subr.bf16.mxu1 %v7937_v6  ;;  %v6232_v35 = vsub.s32 1, %v6223_v28  ;;  %v6235_v36 = vsub.s32 0, %v6223_v28  ;;  %v338_v41 = vand.u32 4294901760, %v297_v39  ;;  %v341_v42 = vand.u32 4294901760, %v298_v40  ;;  %v6384_v0 = vld [vmem:[#allocation5] sm:$0xff]  ;;  %s6068_s25 = scalar_lea.vmem %s3628_s24, 32 }
  0x51   :  { %v6225_v29 = vpack.c.bf16 %v329_v27, %v326_v26  ;;  %7982 = vst [vmem:[#allocation16_spill] sm:$0xff] %v6227_v32  ;;  %v6237_v37 = vpack.c.bf16 %v335_v34, %v332_v33  ;;  %v6247_v48 = vsub.f32 %v291_v18, %v320_v20  ;;  %v6249_v49 = vsub.f32 %v292_v19, %v323_v21  ;;  %p6069_p4 = scmp.ne.s32.totalorder %s3628_s24, %s6068_s25  ;;  %p6074_p6 = scmp.lt.s32.totalorder %s6068_s25, %s6068_s25 }
  0x52   :  { %7983 = vst [vmem:[#allocation17_spill] sm:$0xff] %v6232_v35  ;;  %7984 = vst [vmem:[#allocation18_spill] sm:$0xff] %v6235_v36  ;;  %v6245_v47 = vpack.c.bf16 %v341_v42, %v338_v41  ;;  %v6251_v50 = vsub.f32 %v293_v24, %v326_v26  ;;  %v6253_v51 = vsub.f32 %v294_v25, %v329_v27  ;;  %v344_v57 = vand.u32 4294901760, %v299_v52 }
  0x53   :  { %5210 = vmatpush3.bf16.msra.mxu1 %v6214_v17  ;;  %v6255_v54 = vsub.f32 %v295_v30, %v332_v33  ;;  %v6257_v55 = vsub.f32 %v296_v31, %v335_v34  ;;  %v6259_v56 = vsub.f32 %v297_v39, %v338_v41  ;;  %v6262_v58 = vsub.f32 %v298_v40, %v341_v42  ;;  %p6075_p7 = por %p6074_p6, %p6073_p5 }
  0x54   :  { %5211 = vmatprep.subr.bf16.mxu1 %v7937_v6  ;;  %7985 = vst [vmem:[#allocation19_spill] sm:$0xff] %v6245_v47  ;;  %v347_v59 = vand.u32 4294901760, %v300_v53  ;;  %v350_v63 = vand.u32 4294901760, %v301_v61  ;;  %v353_v2 = vand.u32 4294901760, %v302_v62  ;;  %v7918_v3 = vand.u32 4294901760, %v6205_v13  ;;  %7989 = vst [vmem:[#allocation23_spill] sm:$0xff] %v6384_v0 }
  0x55   :  { %v7917_v4 = vand.u32 4294901760, %v6207_v14  ;;  %v6271_v5 = vsub.f32 %v299_v52, %v344_v57  ;;  %v7916_v20 = vand.u32 4294901760, %v6209_v15  ;;  %v7915_v21 = vand.u32 4294901760, %v6211_v16  ;;  %p6076_p8 = pnand %p6075_p7, %p6069_p4 }
  0x56   :  { %v6265_v60 = vpack.c.bf16 %v347_v59, %v344_v57  ;;  %v6273_v7 = vsub.f32 %v300_v53, %v347_v59  ;;  %v6276_v8 = vpack.c.bf16 %v353_v2, %v350_v63  ;;  %v6278_v9 = vsub.f32 %v301_v61, %v350_v63 }
  0x57   :  { %5213 = vmatpush3.bf16.msra.mxu1 %v6219_v23  ;;  %v6280_v10 = vsub.f32 %v302_v62, %v353_v2  ;;  %v409_v11 = vsub.f32 %v6207_v14, %v7917_v4  ;;  %v416_v24 = vsub.f32 %v6209_v15, %v7916_v20  ;;  %v423_v25 = vsub.f32 %v6211_v16, %v7915_v21 }
  0x58   :  { %5214 = vmatprep.subr.bf16.mxu1 %v7937_v6  ;;  %7986 = vst [vmem:[#allocation20_spill] sm:$0xff] %v6265_v60  ;;  %7987 = vst [vmem:[#allocation21_spill] sm:$0xff] %v6276_v8  ;;  %v7914_v30 = vand.u32 4294901760, %v6247_v48  ;;  %v7913_v31 = vand.u32 4294901760, %v6249_v49  ;;  %v7912_v41 = vand.u32 4294901760, %v6251_v50  ;;  %v7911_v42 = vand.u32 4294901760, %v6253_v51 }
  0x59   :  { %v410_v19 = vand.u32 4294901760, %v409_v11  ;;  %v417_v26 = vand.u32 4294901760, %v416_v24  ;;  %v424_v27 = vand.u32 4294901760, %v423_v25  ;;  %v7910_v57 = vand.u32 4294901760, %v6255_v54 }
  0x5a   :  { %v430_v34 = vsub.f32 %v6247_v48, %v7914_v30  ;;  %v7909_v59 = vand.u32 4294901760, %v6257_v55  ;;  %v7908_v11 = vand.u32 4294901760, %v6259_v56  ;;  %vm135_vm2 = vcmask 1041409  }
  0x5b   :  { %5216 = vmatpush3.bf16.msra.mxu1 %v6225_v29  ;;  %v6306_v33 = vpack.c.bf16 %v424_v27, %v417_v26  ;;  %v458_v62 = vsub.f32 %v6255_v54, %v7910_v57  ;;  %vm124_vm4 = vcmask 130112   ;;  %vm138_vm5 = vcmask 123904  }
  0x5c   :  { %5217 = vmatprep.subr.bf16.mxu1 %v7937_v6  ;;  %v431_v39 = vand.u32 4294901760, %v430_v34  ;;  %v465_v63 = vsub.f32 %v6257_v55, %v7909_v59  ;;  %v472_v24 = vsub.f32 %v6259_v56, %v7908_v11  ;;  %v7906_v34 = vand.u32 4294901760, %v6271_v5 }
  0x5d   :  { %v459_v2 = vand.u32 4294901760, %v458_v62  ;;  %v7903_v62 = vand.u32 4294901760, %v6280_v10  ;;  %vm1612_vm6 = vcmask 1041408  }
  0x5e   :  { %v473_v26 = vand.u32 4294901760, %v472_v24 }
  0x5f   :  { %5219 = vmatpush3.bf16.msra.mxu1 %v6237_v37 }
  0x60   :  { %5220 = vmatprep.subr.bf16.mxu1 %v7937_v6 }
  0x63   :  { %5222 = vmatpush3.bf16.msra.mxu1 %v6245_v47  ;;  %v7996_v47 = vmov 0.0|0.0  }
  0x64   :  { %5223 = vmatprep.subr.bf16.mxu1 %v7937_v6 }
  0x67   :  { %5225 = vmatpush3.bf16.msra.mxu1 %v6265_v60 }
  0x68   :  { %5226 = vmatprep.subr.bf16.mxu1 %v7937_v6 }
  0x6b   :  { %5228 = vmatpush3.bf16.msra.mxu1 %v6276_v8 }
  0x6c   :  { %5229 = vmatprep.subr.bf16.mxu1 %v7937_v6 }
  0xca   :  { %v210_v38 = vpop.permute.xlu0 %209 }
  0xcb   :  { %vm211_vm0 = vcmp.eq.s32.totalorder %v6227_v32, %v210_v38  ;;  %v437_v38 = vsub.f32 %v6249_v49, %v7913_v31  ;;  %v273_v31 = vld [vmem:[#allocation8 + $0x18] sm:$0xff] }
  0xcc   :  { %v3640_v44 = vsel %vm211_vm0, 1.0, %v7919_v43 }
  0xcd   :  { %v252_v45 = vrot.slane %v3640_v44, %v6232_v35  ;;  %v245_v46 = vrot.slane %v3640_v44, %v6235_v36  ;;  %v438_v40 = vand.u32 4294901760, %v437_v38  ;;  %v7905_v38 = vand.u32 4294901760, %v6273_v7 }
  0xcf   :  { %254 = vbcast.lane.b32.xlu1 %v252_v45, 256  ;;  %247 = vbcast.lane.b32.xlu0 %v245_v46, 256  ;;  %v6316_v44 = vpack.c.bf16 %v438_v40, %v431_v39  ;;  %v444_v45 = vsub.f32 %v6251_v50, %v7912_v41  ;;  %v451_v46 = vsub.f32 %v6253_v51, %v7911_v42  ;;  %v272_v41 = vld [vmem:[#allocation8 + $0x10] sm:$0xff] }
  0xd0   :  { %v486_v40 = vsub.f32 %v6271_v5, %v7906_v34 }
  0xd1   :  { %v445_v52 = vand.u32 4294901760, %v444_v45  ;;  %v452_v53 = vand.u32 4294901760, %v451_v46  ;;  %v493_v45 = vsub.f32 %v6273_v7, %v7905_v38 }
  0xd2   :  { %v487_v46 = vand.u32 4294901760, %v486_v40 }
  0xd3   :  { %203 = vperm.xlu1 %5949, %v6198_v1   ;;  %v402_v1 = vsub.f32 %v6205_v13, %v7918_v3  ;;  %v6326_v61 = vpack.c.bf16 %v452_v53, %v445_v52  ;;  %v494_v52 = vand.u32 4294901760, %v493_v45  ;;  %v7904_v53 = vand.u32 4294901760, %v6278_v9 }
  0xd4   :  { %v959_v3 = vand.u32 4294901760, %v272_v41 }
  0xd5   :  { %v403_v18 = vand.u32 4294901760, %v402_v1  ;;  %v466_v1 = vand.u32 4294901760, %v465_v63  ;;  %v6356_v63 = vpack.c.bf16 %v494_v52, %v487_v46  ;;  %v275_v52 = vld [vmem:[#allocation8 + $0x28] sm:$0xff] }
  0xd6   :  { %v6398_v40 = vsub.f32 %v272_v41, %v959_v3 }
  0xd7   :  { %v6296_v22 = vpack.c.bf16 %v410_v19, %v403_v18  ;;  %v7907_v18 = vand.u32 4294901760, %v6262_v58  ;;  %v6336_v19 = vpack.c.bf16 %v466_v1, %v459_v2  ;;  %v500_v2 = vsub.f32 %v6278_v9, %v7904_v53  ;;  %v271_v53 = vld [vmem:[#allocation8 + $0x8] sm:$0xff] }
  0xd8   :  { %v507_v1 = vsub.f32 %v6280_v10, %v7903_v62  ;;  %v270_v62 = vld [vmem:[#allocation8] sm:$0xff]  ;;  %v956_v34 = vand.u32 4294901760, %v271_v53 }
  0xd9   :  { %v479_v25 = vsub.f32 %v6262_v58, %v7907_v18  ;;  %v501_v24 = vand.u32 4294901760, %v500_v2  ;;  %v953_v38 = vand.u32 4294901760, %v270_v62 }
  0xda   :  { %v6393_v4 = vsub.f32 %v271_v53, %v956_v34 }
  0xdb   :  { %v480_v27 = vand.u32 4294901760, %v479_v25  ;;  %v508_v25 = vand.u32 4294901760, %v507_v1  ;;  %v6388_v42 = vpack.c.bf16 %v956_v34, %v953_v38  ;;  %v6391_v20 = vsub.f32 %v270_v62, %v953_v38 }
  0xdc   :  { %v968_v38 = vand.u32 4294901760, %v275_v52 }
  0xdd   :  { %v6346_v39 = vpack.c.bf16 %v480_v27, %v473_v26  ;;  %v6364_v26 = vpack.c.bf16 %v508_v25, %v501_v24  ;;  %v6382_v25 = vld [vmem:[#allocation5 + $0x8] sm:$0xff]  ;;  %7990 = vst [vmem:[#allocation24_spill] sm:$0xff] %v6388_v42  ;;  %5351 = vmatpush3.bf16.msra.mxu0 %v6388_v42  ;;  %v962_v24 = vand.u32 4294901760, %v273_v31 }
  0xde   :  { %7988 = vst [vmem:[#allocation22_spill] sm:$0xff] %v6382_v25  ;;  %5352 = vmatprep.subr.bf16.mxu0 %v7937_v6 }
  0xdf   :  { %v6396_v2 = vpack.c.bf16 %v962_v24, %v959_v3  ;;  %v6400_v27 = vsub.f32 %v273_v31, %v962_v24 }
  0xe1   :  { %7991 = vst [vmem:[#allocation25_spill] sm:$0xff] %v6396_v2  ;;  %5354 = vmatpush3.bf16.msra.mxu0 %v6396_v2 }
  0xe2   :  { %5355 = vmatprep.subr.bf16.mxu0 %v7937_v6 }
 0x141   :  { %v255_v18 = vpop.permute.xlu1 %254  ;;  %v248_v11 = vpop.permute.xlu0 %247 }
 0x142   :  { %v257_v59 = vmul.f32 %v255_v18, %v6382_v25  ;;  %v256_v57 = vmul.f32 %v248_v11, %v6384_v0  ;;  %v274_v11 = vld [vmem:[#allocation8 + $0x20] sm:$0xff] }
 0x143   :  { %v965_v34 = vand.u32 4294901760, %v274_v11 }
 0x144   :  { %v264_v30 = vrot.slane %v257_v59, 4  ;;  %v258_v21 = vrot.slane %v256_v57, 4 }
 0x146   :  { %v265_v1 = vadd.f32 %v264_v30, %v257_v59  ;;  %v259_v18 = vadd.f32 %v258_v21, %v256_v57  ;;  %v6404_v30 = vpack.c.bf16 %v968_v38, %v965_v34  ;;  %v276_v21 = vld [vmem:[#allocation8 + $0x30] sm:$0xff]  ;;  %v277_v57 = vld [vmem:[#allocation8 + $0x38] sm:$0xff] }
 0x147   :  { %v971_v28 = vand.u32 4294901760, %v276_v21  ;;  %v974_v42 = vand.u32 4294901760, %v277_v57 }
 0x148   :  { %v266_v46 = vrot.slane %v265_v1, 2  ;;  %v260_v45 = vrot.slane %v259_v18, 2  ;;  %7992 = vst [vmem:[#allocation26_spill] sm:$0xff] %v6404_v30  ;;  %5357 = vmatpush3.bf16.msra.mxu0 %v6404_v30 }
 0x149   :  { %5358 = vmatprep.subr.bf16.mxu0 %v7937_v6  ;;  %v6408_v41 = vpack.c.bf16 %v974_v42, %v971_v28 }
 0x14a   :  { %v267_v53 = vadd.f32 %v266_v46, %v265_v1  ;;  %v261_v62 = vadd.f32 %v260_v45, %v259_v18  ;;  %v278_v45 = vld [vmem:[#allocation8 + $0x40] sm:$0xff]  ;;  %v279_v46 = vld [vmem:[#allocation8 + $0x48] sm:$0xff] }
 0x14b   :  { %7993 = vst [vmem:[#allocation27_spill] sm:$0xff] %v6408_v41  ;;  %v977_v24 = vand.u32 4294901760, %v278_v45  ;;  %v980_v18 = vand.u32 4294901760, %v279_v46 }
 0x14c   :  { %v268_v59 = vrot.slane %v267_v53, 1  ;;  %v262_v43 = vrot.slane %v261_v62, 1  ;;  %5360 = vmatpush3.bf16.msra.mxu0 %v6408_v41 }
 0x14d   :  { %5361 = vmatprep.subr.bf16.mxu0 %v7937_v6  ;;  %v6415_v30 = vpack.c.bf16 %v980_v18, %v977_v24  ;;  %v6426_v6 = vsub.f32 %v274_v11, %v965_v34  ;;  %v282_v11 = vld [vmem:[#allocation8 + $0x60] sm:$0xff]  ;;  %v283_v34 = vld [vmem:[#allocation8 + $0x68] sm:$0xff] }
 0x14e   :  { %v269_v3 = vadd.f32 %v268_v59, %v267_v53  ;;  %v263_v31 = vadd.f32 %v262_v43, %v261_v62  ;;  %v280_v53 = vld [vmem:[#allocation8 + $0x50] sm:$0xff]  ;;  %v281_v62 = vld [vmem:[#allocation8 + $0x58] sm:$0xff]  ;;  %v7995_v59 = vmov 0.0  }
 0x14f   :  { %7994 = vst [vmem:[#allocation28_spill] sm:$0xff] %v6415_v30  ;;  %v986_v25 = vand.u32 4294901760, %v281_v62 }
 0x150   :  { %v305_v1 = vsel %vm135_vm2, %v269_v3, %v263_v31  ;;  %v983_v31 = vand.u32 4294901760, %v280_v53  ;;  %5363 = vmatpush3.bf16.msra.mxu0 %v6415_v30 }
 0x151   :  { %v6411_v2 = vand.u32 4294901760, %v305_v1  ;;  %5364 = vmatprep.subr.bf16.mxu0 %v7996_v47 }
 0x152   :  { %v204_v0 = vpop.permute.xlu1 %203 }
 0x153   :  { %vm205_vm3 = vcmp.eq.s32.totalorder %v6227_v32, %v204_v0  ;;  %v6419_v43 = vsub.f32 %v305_v1, %v6411_v2  ;;  %v6428_v0 = vsub.f32 %v275_v52, %v968_v38  ;;  %v6430_v1 = vsub.f32 %v276_v21, %v971_v28 }
 0x154   :  { %v3639_v3 = vsel %vm205_vm3, 1.0, %v7995_v59  ;;  %v6432_v32 = vsub.f32 %v277_v57, %v974_v42  ;;  %v6442_v52 = vpack.c.bf16 %v986_v25, %v983_v31  ;;  %v6444_v28 = vsub.f32 %v280_v53, %v983_v31 }
 0x155   :  { %v224_v8 = vrot.slane %v3639_v3, %v6232_v35  ;;  %v217_v41 = vrot.slane %v3639_v3, %v6235_v36  ;;  %v7945_v60 = vand.u32 4294901760, %v6419_v43  ;;  %v6438_v35 = vsub.f32 %v278_v45, %v977_v24  ;;  %v285_v45 = vld [vmem:[#allocation8 + $0x78] sm:$0xff] }
 0x156   :  { %v6440_v36 = vsub.f32 %v279_v46, %v980_v18  ;;  %7997 = vst [vmem:[#allocation29_spill] sm:$0xff] %v6442_v52  ;;  %v6446_v42 = vsub.f32 %v281_v62, %v986_v25  ;;  %v989_v21 = vand.u32 4294901760, %v282_v11  ;;  %5366 = vmatpush3.bf16.msra.mxu0 %v6442_v52  ;;  %v998_v18 = vand.u32 4294901760, %v285_v45 }
 0x157   :  { %226 = vbcast.lane.b32.xlu1 %v224_v8, 256  ;;  %219 = vbcast.lane.b32.xlu0 %v217_v41, 256  ;;  %v391_v3 = vsub.f32 %v6419_v43, %v7945_v60  ;;  %v992_v8 = vand.u32 4294901760, %v283_v34  ;;  %v284_v41 = vld [vmem:[#allocation8 + $0x70] sm:$0xff]  ;;  %v1095_v60 = vand.u32 4294901760, %v6432_v32  ;;  %v8005_v52 = vpack.c.bf16 %v6253_v51, %v6251_v50 }
 0x158   :  { %5367 = vmatprep.subr.bf16.mxu0 %v7996_v47  ;;  %v6455_v46 = vsub.f32 %v282_v11, %v989_v21  ;;  %v995_v24 = vand.u32 4294901760, %v284_v41  ;;  %v6467_v62 = vsub.f32 %v285_v45, %v998_v18  ;;  %v1123_v30 = vand.u32 4294901760, %v6446_v42 }
 0x159   :  { %v392_v38 = vand.u32 4294901760, %v391_v3  ;;  %v6450_v57 = vpack.c.bf16 %v992_v8, %v989_v21  ;;  %v6457_v25 = vsub.f32 %v283_v34, %v992_v8  ;;  %v3638_v34 = vld [vmem:[%s7900_s4] ss:$0 sm:$0xff]  ;;  %v78_v21 = vld [vmem:[#allocation7 + $0x10] sm:$0xff]  ;;  %v1046_v8 = vand.u32 4294901760, %v6391_v20 }
 0x15a   :  { %v6461_v53 = vpack.c.bf16 %v998_v18, %v995_v24  ;;  %v87_v45 = vmul.f32 %v3638_v34, %v78_v21  ;;  %v1060_v3 = vand.u32 4294901760, %v6398_v40 }
 0x15b   :  { %4188 = vmatmul.mubr.f32.vlgmr.msra.gmra.mrb[0].mxu1 %v392_v38  ;;  %7998 = vst [vmem:[#allocation30_spill] sm:$0xff] %v6450_v57  ;;  %5369 = vmatpush3.bf16.msra.mxu0 %v6450_v57  ;;  %v1047_v18 = vsub.f32 %v6391_v20, %v1046_v8  ;;  %v1109_v57 = vand.u32 4294901760, %v6440_v36 }
 0x15c   :  { %5231 = vmatpush3.bf16.msra.mxu1 %v6296_v22  ;;  %4222 = vmatprep.mubr.msk.f32.mxu1 %vm6108_vm1, %v7995_v59  ;;  %7999 = vst [vmem:[#allocation31_spill] sm:$0xff] %v6461_v53  ;;  %v6465_v22 = vsub.f32 %v284_v41, %v995_v24  ;;  %v1053_v41 = vand.u32 4294901760, %v6393_v4  ;;  %v79_v24 = vld [vmem:[#allocation7 + $0x18] sm:$0xff]  ;;  %v1061_v31 = vsub.f32 %v6398_v40, %v1060_v3 }
 0x15d   :  { %5232 = vmatprep.subr.bf16.mxu1 %v7996_v47  ;;  %5370 = vmatprep.subr.bf16.mxu0 %v7996_v47 }
 0x15f   :  { %5372 = vmatpush3.bf16.msra.mxu0 %v6461_v53  ;;  %v8002_v53 = vpack.c.bf16 %v6249_v49, %v6247_v48 }
 0x160   :  { %5234 = vmatpush3.bf16.msra.mxu1 %v6306_v33  ;;  %5397 = vmatprep.subr.bf16.mxu0 %v7996_v47  ;;  %v1067_v33 = vand.u32 4294901760, %v6400_v27 }
 0x161   :  { %5235 = vmatprep.subr.bf16.mxu1 %v7996_v47 }
 0x164   :  { %5237 = vmatpush3.bf16.msra.mxu1 %v6316_v44  ;;  %v76_v44 = vld [vmem:[#allocation7] sm:$0xff] }
 0x165   :  { %5238 = vmatprep.subr.bf16.mxu1 %v7996_v47 }
 0x168   :  { %5240 = vmatpush3.bf16.msra.mxu1 %v6326_v61  ;;  %v85_v61 = vmul.f32 %v3638_v34, %v76_v44  ;;  %v1054_v44 = vsub.f32 %v6393_v4, %v1053_v41 }
 0x169   :  { %5241 = vmatprep.subr.bf16.mxu1 %v7996_v47 }
 0x16a   :  { %v1055_v11 = vand.u32 4294901760, %v1054_v44 }
 0x16c   :  { %5243 = vmatpush3.bf16.msra.mxu1 %v6336_v19  ;;  %v77_v19 = vld [vmem:[#allocation7 + $0x8] sm:$0xff] }
 0x16d   :  { %5244 = vmatprep.subr.bf16.mxu1 %v7996_v47  ;;  %v86_v38 = vmul.f32 %v3638_v34, %v77_v19  ;;  %v1068_v19 = vsub.f32 %v6400_v27, %v1067_v33 }
 0x170   :  { %5246 = vmatpush3.bf16.msra.mxu1 %v6346_v39  ;;  %v1088_v39 = vand.u32 4294901760, %v6430_v1 }
 0x171   :  { %5247 = vmatprep.subr.bf16.mxu1 %v7996_v47 }
 0x174   :  { %5249 = vmatpush3.bf16.msra.mxu1 %v6356_v63  ;;  %v1048_v63 = vand.u32 4294901760, %v1047_v18 }
 0x175   :  { %5250 = vmatprep.subr.bf16.mxu1 %v7996_v47 }
 0x176   :  { %89 = vadd.xlane.f32.xlu0 %v85_v61  ;;  %v88_v61 = vmul.f32 %v3638_v34, %v79_v24  ;;  %v6505_v21 = vpack.c.bf16 %v1055_v11, %v1048_v63  ;;  %v1062_v34 = vand.u32 4294901760, %v1061_v31  ;;  %v1069_v11 = vand.u32 4294901760, %v1068_v19 }
 0x177   :  { %v1081_v24 = vand.u32 4294901760, %v6428_v0  ;;  %v8001_v31 = vpack.c.bf16 %v6211_v16, %v6209_v15 }
 0x178   :  { %5252 = vmatpush3.bf16.msra.mxu1 %v6364_v26  ;;  %v8000_v26 = vpack.c.bf16 %v6207_v14, %v6205_v13  ;;  %v6520_v18 = vpack.c.bf16 %v1069_v11, %v1062_v34  ;;  %v6534_v34 = vpack.c.bf16 %v1053_v41, %v1046_v8  ;;  %v1089_v11 = vsub.f32 %v6430_v1, %v1088_v39 }
 0x179   :  { %5253 = vmatprep.subr.bf16.mxu1 %v7996_v47  ;;  %v1082_v63 = vsub.f32 %v6428_v0, %v1081_v24  ;;  %v6546_v8 = vpack.c.bf16 %v1067_v33, %v1060_v3 }
 0x17a   :  { %93 = vadd.xlane.f32.xlu0 %v87_v45  ;;  %v1074_v45 = vand.u32 4294901760, %v6426_v6 }
 0x17b   :  { %4223 = vmatmul.mubr.f32.vlgmr.msra.gmra.mrb[2].mxu1 %v6411_v2  ;;  %91 = vadd.xlane.f32.xlu1 %v86_v38  ;;  %v1096_v38 = vsub.f32 %v6432_v32, %v1095_v60  ;;  %8004 = vst [vmem:[#allocation33_spill] sm:$0xff] %v6546_v8  ;;  %v8008_v8 = vpack.c.bf16 %v6257_v55, %v6255_v54 }
 0x17c   :  { %5255 = vmatpush3.bf16.msra.mxu1 %v8000_v26  ;;  %4257 = vmatprep.mubr.msk.f32.mxu1 %vm6108_vm1, %v7995_v59  ;;  %v1075_v44 = vsub.f32 %v6426_v6, %v1074_v45  ;;  %v1083_v26 = vand.u32 4294901760, %v1082_v63  ;;  %v6558_v33 = vpack.c.bf16 %v1081_v24, %v1074_v45  ;;  %v6570_v45 = vpack.c.bf16 %v1095_v60, %v1088_v39 }
 0x17d   :  { %5256 = vmatprep.subr.bf16.mxu1 %v7996_v47  ;;  %v1097_v63 = vand.u32 4294901760, %v1096_v38 }
 0x17e   :  { %95 = vadd.xlane.f32.xlu0 %v88_v61  ;;  %v1076_v19 = vand.u32 4294901760, %v1075_v44  ;;  %v1090_v44 = vand.u32 4294901760, %v1089_v11  ;;  %v1116_v11 = vand.u32 4294901760, %v6444_v28  ;;  %8007 = vst [vmem:[#allocation35_spill] sm:$0xff] %v6558_v33  ;;  %8010 = vst [vmem:[#allocation37_spill] sm:$0xff] %v6570_v45  ;;  %v8011_v33 = vpack.c.bf16 %v6262_v58, %v6259_v56 }
 0x17f   :  { %v8012_v45 = vpack.c.bf16 %v6273_v7, %v6271_v5 }
 0x180   :  { %5258 = vmatpush3.bf16.msra.mxu1 %v8001_v31  ;;  %v6532_v61 = vpack.c.bf16 %v1083_v26, %v1076_v19  ;;  %v1102_v31 = vand.u32 4294901760, %v6438_v35  ;;  %v6544_v19 = vpack.c.bf16 %v1097_v63, %v1090_v44  ;;  %v1110_v26 = vsub.f32 %v6440_v36, %v1109_v57 }
 0x181   :  { %5259 = vmatprep.subr.bf16.mxu1 %v7996_v47  ;;  %v1117_v3 = vsub.f32 %v6444_v28, %v1116_v11  ;;  %v1124_v63 = vsub.f32 %v6446_v42, %v1123_v30 }
 0x182   :  { %8003 = vst [vmem:[#allocation32_spill] sm:$0xff] %v6544_v19  ;;  %v1103_v41 = vsub.f32 %v6438_v35, %v1102_v31  ;;  %v1111_v38 = vand.u32 4294901760, %v1110_v26  ;;  %v1130_v26 = vand.u32 4294901760, %v6455_v46  ;;  %v1137_v19 = vand.u32 4294901760, %v6457_v25 }
 0x183   :  { %v6582_v60 = vpack.c.bf16 %v1109_v57, %v1102_v31  ;;  %v8013_v57 = vpack.c.bf16 %v6280_v10, %v6278_v9 }
 0x184   :  { %5261 = vmatpush3.bf16.msra.mxu1 %v8002_v53  ;;  %v1104_v53 = vand.u32 4294901760, %v1103_v41  ;;  %v1125_v41 = vand.u32 4294901760, %v1124_v63  ;;  %v1131_v24 = vsub.f32 %v6455_v46, %v1130_v26  ;;  %v1144_v63 = vand.u32 4294901760, %v6465_v22 }
 0x185   :  { %5262 = vmatprep.subr.bf16.mxu1 %v7996_v47  ;;  %v6598_v31 = vpack.c.bf16 %v1137_v19, %v1130_v26  ;;  %v8018_v26 = vand.u32 4294901760, %v6207_v14  ;;  %v8023_v14 = vand.u32 4294901760, %v6249_v49  ;;  %v8028_v49 = vld [vmem:[#allocation22_spill] sm:$0xff] }
 0x186   :  { %v6556_v44 = vpack.c.bf16 %v1111_v38, %v1104_v53  ;;  %v1138_v38 = vsub.f32 %v6457_v25, %v1137_v19  ;;  %v1145_v39 = vsub.f32 %v6465_v22, %v1144_v63  ;;  %v8015_v19 = vld [vmem:[#allocation20_spill] sm:$0xff] }
 0x188   :  { %5264 = vmatpush3.bf16.msra.mxu1 %v8005_v52  ;;  %8006 = vst [vmem:[#allocation34_spill] sm:$0xff] %v6556_v44  ;;  %v1118_v52 = vand.u32 4294901760, %v1117_v3  ;;  %v1139_v3 = vand.u32 4294901760, %v1138_v38  ;;  %v1151_v44 = vand.u32 4294901760, %v6467_v62 }
 0x189   :  { %5265 = vmatprep.subr.bf16.mxu1 %v7996_v47 }
 0x18a   :  { %v6568_v53 = vpack.c.bf16 %v1125_v41, %v1118_v52  ;;  %v1152_v41 = vsub.f32 %v6467_v62, %v1151_v44 }
 0x18c   :  { %5267 = vmatpush3.bf16.msra.mxu1 %v8008_v8  ;;  %8009 = vst [vmem:[#allocation36_spill] sm:$0xff] %v6568_v53  ;;  %v1132_v8 = vand.u32 4294901760, %v1131_v24  ;;  %v1153_v24 = vand.u32 4294901760, %v1152_v41  ;;  %v6592_v53 = vpack.c.bf16 %v1123_v30, %v1116_v11  ;;  %v8014_v30 = vld [vmem:[#allocation19_spill] sm:$0xff]  ;;  %v8016_v11 = vld [vmem:[#allocation21_spill] sm:$0xff] }
 0x18d   :  { %5268 = vmatprep.subr.bf16.mxu1 %v7996_v47 }
 0x18e   :  { %v6580_v52 = vpack.c.bf16 %v1139_v3, %v1132_v8  ;;  %v8019_v3 = vand.u32 4294901760, %v6419_v43 }
 0x190   :  { %5270 = vmatpush3.bf16.msra.mxu1 %v8011_v33  ;;  %v1146_v33 = vand.u32 4294901760, %v1145_v39  ;;  %v8021_v39 = vand.u32 4294901760, %v6211_v16 }
 0x191   :  { %5271 = vmatprep.subr.bf16.mxu1 %v7996_v47 }
 0x192   :  { %v6590_v38 = vpack.c.bf16 %v1153_v24, %v1146_v33  ;;  %v8026_v24 = vand.u32 4294901760, %v6255_v54 }
 0x194   :  { %5273 = vmatpush3.bf16.msra.mxu1 %v8012_v45  ;;  %v6605_v45 = vpack.c.bf16 %v1151_v44, %v1144_v63  ;;  %v8017_v44 = vand.u32 4294901760, %v6205_v13  ;;  %v8020_v63 = vand.u32 4294901760, %v6209_v15  ;;  %v8022_v13 = vand.u32 4294901760, %v6247_v48 }
 0x195   :  { %5274 = vmatprep.subr.bf16.mxu1 %v7996_v47  ;;  %v8025_v15 = vand.u32 4294901760, %v6253_v51  ;;  %v8030_v51 = vand.u32 4294901760, %v6259_v56 }
 0x196   :  { %v5302_v8 = vpack.c.bf16 %v8018_v26, %v8017_v44  ;;  %v5305_v41 = vpack.c.bf16 %v8021_v39, %v8020_v63  ;;  %v5308_v33 = vpack.c.bf16 %v8023_v14, %v8022_v13 }
 0x198   :  { %5276 = vmatpush3.bf16.msra.mxu1 %v8013_v57  ;;  %v8027_v57 = vand.u32 4294901760, %v6257_v55 }
 0x199   :  { %5277 = vmatprep.subr.bf16.mxu1 %v7996_v47 }
 0x19a   :  { %v5314_v44 = vpack.c.bf16 %v8027_v57, %v8026_v24 }
 0x19b   :  { %4258 = vmatmul.mubr.f32.vlgmr.msra.gmra.mrb[4].mxu1 %v6419_v43  ;;  %v8024_v43 = vand.u32 4294901760, %v6251_v50 }
 0x19c   :  { %5279 = vmatpush3.bf16.msra.mxu1 %v6203_v12  ;;  %4292 = vmatprep.mubr.msk.f32.mxu1 %vm6108_vm1, %v7995_v59 }
 0x19d   :  { %5280 = vmatprep.subr.bf16.mxu1 %v7996_v47  ;;  %v5311_v16 = vpack.c.bf16 %v8025_v15, %v8024_v43  ;;  %v8032_v43 = vand.u32 4294901760, %v6271_v5  ;;  %v8033_v15 = vand.u32 4294901760, %v6273_v7 }
 0x1a0   :  { %5282 = vmatpush3.bf16.msra.mxu1 %v6214_v17 }
 0x1a1   :  { %5283 = vmatprep.subr.bf16.mxu1 %v7996_v47 }
 0x1a4   :  { %5285 = vmatpush3.bf16.msra.mxu1 %v6219_v23 }
 0x1a5   :  { %5286 = vmatprep.subr.bf16.mxu1 %v7996_v47 }
 0x1a8   :  { %5288 = vmatpush3.bf16.msra.mxu1 %v6225_v29 }
 0x1a9   :  { %5289 = vmatprep.subr.bf16.mxu1 %v7996_v47 }
 0x1ac   :  { %5291 = vmatpush3.bf16.msra.mxu1 %v6237_v37 }
 0x1ad   :  { %5292 = vmatprep.subr.bf16.mxu1 %v7996_v47 }
 0x1b0   :  { %5294 = vmatpush3.bf16.msra.mxu1 %v8014_v30 }
 0x1b1   :  { %5295 = vmatprep.subr.bf16.mxu1 %v7996_v47 }
 0x1b4   :  { %5297 = vmatpush3.bf16.msra.mxu1 %v8015_v19 }
 0x1b5   :  { %5298 = vmatprep.subr.bf16.mxu1 %v7996_v47 }
 0x1b8   :  { %5300 = vmatpush3.bf16.msra.mxu1 %v8016_v11 }
 0x1b9   :  { %5301 = vmatprep.subr.bf16.mxu1 %v7996_v47 }
 0x1bb   :  { %4293 = vmatmul.mubr.f32.vlgmr.msra.gmra.mrb[6].mxu1 %v8019_v3  ;;  %v8029_v3 = vld [vmem:[#allocation23_spill] sm:$0xff] }
 0x1bc   :  { %5303 = vmatpush3.bf16.msra.mxu1 %v5302_v8  ;;  %4327 = vmatprep.mubr.msk.f32.mxu1 %vm6108_vm1, %v7995_v59 }
 0x1bd   :  { %5304 = vmatprep.subr.bf16.mxu1 %v7996_v47 }
 0x1c0   :  { %5306 = vmatpush3.bf16.msra.mxu1 %v5305_v41  ;;  %v8031_v41 = vand.u32 4294901760, %v6262_v58  ;;  %v8034_v58 = vand.u32 4294901760, %v6278_v9 }
 0x1c1   :  { %5307 = vmatprep.subr.bf16.mxu1 %v7996_v47 }
 0x1c2   :  { %v5317_v13 = vpack.c.bf16 %v8031_v41, %v8030_v51 }
 0x1c4   :  { %5309 = vmatpush3.bf16.msra.mxu1 %v5308_v33 }
 0x1c5   :  { %5310 = vmatprep.subr.bf16.mxu1 %v7996_v47 }
 0x1c8   :  { %5312 = vmatpush3.bf16.msra.mxu1 %v5311_v16  ;;  %v5320_v16 = vpack.c.bf16 %v8033_v15, %v8032_v43  ;;  %v8055_v15 = vld [vmem:[#allocation27_spill] sm:$0xff] }
 0x1c9   :  { %v227_v48 = vpop.permute.xlu1 %226  ;;  %v220_v26 = vpop.permute.xlu0 %219  ;;  %5313 = vmatprep.subr.bf16.mxu1 %v7996_v47 }
 0x1ca   :  { %v229_v8 = vmul.f32 %v227_v48, %v8028_v49  ;;  %v228_v63 = vmul.f32 %v220_v26, %v8029_v3  ;;  %v8035_v48 = vand.u32 4294901760, %v6280_v10 }
 0x1cc   :  { %v236_v50 = vrot.slane %v229_v8, 4  ;;  %v230_v39 = vrot.slane %v228_v63, 4  ;;  %5315 = vmatpush3.bf16.msra.mxu1 %v5314_v44  ;;  %v5323_v26 = vpack.c.bf16 %v8035_v48, %v8034_v58  ;;  %v8058_v58 = vld [vmem:[#allocation30_spill] sm:$0xff]  ;;  %v8059_v48 = vld [vmem:[#allocation31_spill] sm:$0xff] }
 0x1cd   :  { %5316 = vmatprep.subr.bf16.mxu1 %v7996_v47 }
 0x1ce   :  { %v237_v54 = vadd.f32 %v236_v50, %v229_v8  ;;  %v231_v55 = vadd.f32 %v230_v39, %v228_v63  ;;  %v8053_v50 = vld [vmem:[#allocation25_spill] sm:$0xff] }
 0x1d0   :  { %v238_v14 = vrot.slane %v237_v54, 2  ;;  %v232_v33 = vrot.slane %v231_v55, 2  ;;  %5318 = vmatpush3.bf16.msra.mxu1 %v5317_v13  ;;  %v8054_v13 = vld [vmem:[#allocation26_spill] sm:$0xff] }
 0x1d1   :  { %5319 = vmatprep.subr.bf16.mxu1 %v7996_v47 }
 0x1d2   :  { %v239_v24 = vadd.f32 %v238_v14, %v237_v54  ;;  %v233_v57 = vadd.f32 %v232_v33, %v231_v55 }
 0x1d4   :  { %v240_v56 = vrot.slane %v239_v24, 1  ;;  %v234_v44 = vrot.slane %v233_v57, 1  ;;  %5321 = vmatpush3.bf16.msra.mxu1 %v5320_v16 }
 0x1d5   :  { %5322 = vmatprep.subr.bf16.mxu1 %v7996_v47 }
 0x1d6   :  { %v241_v49 = vadd.f32 %v240_v56, %v239_v24  ;;  %v235_v8 = vadd.f32 %v234_v44, %v233_v57  ;;  %v8056_v24 = vld [vmem:[#allocation28_spill] sm:$0xff]  ;;  %v8057_v44 = vld [vmem:[#allocation29_spill] sm:$0xff] }
 0x1d8   :  { %5324 = vmatpush3.bf16.msra.mxu1 %v5323_v26  ;;  %v950_v5 = vsel %vm135_vm2, %v241_v49, %v235_v8 }
 0x1d9   :  { %5325 = vmatprep.subr.bf16.mxu1 %v7996_v47  ;;  %v6668_v7 = vand.u32 4294901760, %v950_v5 }
 0x1db   :  { %4328 = vmatmul.mubr.f32.vlgmr.msra.gmra.mrb[8].mxu1 %v6411_v2  ;;  %v6672_v3 = vsub.f32 %v950_v5, %v6668_v7 }
 0x1dc   :  { %5327 = vmatpush3.bf16.msra.mxu1 %v6203_v12  ;;  %4362 = vmatprep.mubr.msk.f32.mxu1 %vm6108_vm1, %v7995_v59  ;;  %v8036_v12 = vpack.c.bf16 %v6393_v4, %v6391_v20  ;;  %v8044_v20 = vld [vmem:[#allocation32_spill] sm:$0xff] }
 0x1dd   :  { %5328 = vmatprep.subr.bf16.mxu1 %v7996_v47  ;;  %v1035_v9 = vand.u32 4294901760, %v6672_v3 }
 0x1df   :  { %v1036_v10 = vsub.f32 %v6672_v3, %v1035_v9 }
 0x1e0   :  { %5330 = vmatpush3.bf16.msra.mxu1 %v6214_v17  ;;  %v8037_v17 = vpack.c.bf16 %v6400_v27, %v6398_v40  ;;  %v8045_v27 = vld [vmem:[#allocation33_spill] sm:$0xff] }
 0x1e1   :  { %5331 = vmatprep.subr.bf16.mxu1 %v7996_v47  ;;  %v1037_v63 = vand.u32 4294901760, %v1036_v10 }
 0x1e3   :  { %4398 = vmatmul.mubr.f32.vlgmr.msra.gmra.mrb[0].mxu0 %v1037_v63 }
 0x1e4   :  { %5333 = vmatpush3.bf16.msra.mxu1 %v6219_v23  ;;  %5399 = vmatpush3.bf16.msra.mxu0 %v8036_v12  ;;  %v8038_v23 = vpack.c.bf16 %v6428_v0, %v6426_v6  ;;  %v8040_v6 = vpack.c.bf16 %v6440_v36, %v6438_v35  ;;  %v8042_v35 = vpack.c.bf16 %v6457_v25, %v6455_v46  ;;  %v8046_v0 = vld [vmem:[#allocation34_spill] sm:$0xff]  ;;  %v8049_v46 = vld [vmem:[#allocation37_spill] sm:$0xff] }
 0x1e5   :  { %5334 = vmatprep.subr.bf16.mxu1 %v7996_v47  ;;  %5400 = vmatprep.subr.bf16.mxu0 %v7996_v47  ;;  %v8043_v36 = vpack.c.bf16 %v6467_v62, %v6465_v22 }
 0x1e6   :  { %4467 = vmatprep.mubr.msk.f32.mxu0 %vm6108_vm1, %v7995_v59 }
 0x1e8   :  { %5336 = vmatpush3.bf16.msra.mxu1 %v6225_v29  ;;  %5402 = vmatpush3.bf16.msra.mxu0 %v8037_v17  ;;  %v8039_v29 = vpack.c.bf16 %v6432_v32, %v6430_v1  ;;  %v8041_v32 = vpack.c.bf16 %v6446_v42, %v6444_v28  ;;  %v8047_v1 = vld [vmem:[#allocation35_spill] sm:$0xff]  ;;  %v8048_v42 = vld [vmem:[#allocation36_spill] sm:$0xff] }
 0x1e9   :  { %5337 = vmatprep.subr.bf16.mxu1 %v7996_v47  ;;  %5403 = vmatprep.subr.bf16.mxu0 %v7996_v47 }
 0x1ec   :  { %5339 = vmatpush3.bf16.msra.mxu1 %v6237_v37  ;;  %5405 = vmatpush3.bf16.msra.mxu0 %v8038_v23 }
 0x1ed   :  { %5340 = vmatprep.subr.bf16.mxu1 %v7996_v47  ;;  %5406 = vmatprep.subr.bf16.mxu0 %v7996_v47 }
 0x1f0   :  { %5342 = vmatpush3.bf16.msra.mxu1 %v8014_v30  ;;  %5408 = vmatpush3.bf16.msra.mxu0 %v8039_v29  ;;  %v8051_v30 = vld [vmem:[#allocation24_spill] sm:$0xff] }
 0x1f1   :  { %5343 = vmatprep.subr.bf16.mxu1 %v7996_v47  ;;  %5409 = vmatprep.subr.bf16.mxu0 %v7996_v47 }
 0x1f4   :  { %5345 = vmatpush3.bf16.msra.mxu1 %v8015_v19  ;;  %5411 = vmatpush3.bf16.msra.mxu0 %v8040_v6  ;;  %v6832_v6 = vld [vmem:[#allocation8 + $0x180] sm:$0xff] }
 0x1f5   :  { %5346 = vmatprep.subr.bf16.mxu1 %v7996_v47  ;;  %5412 = vmatprep.subr.bf16.mxu0 %v7996_v47 }
 0x1f8   :  { %5348 = vmatpush3.bf16.msra.mxu1 %v8016_v11  ;;  %5414 = vmatpush3.bf16.msra.mxu0 %v8041_v32  ;;  %v6834_v32 = vld [vmem:[#allocation8 + $0x188] sm:$0xff] }
 0x1f9   :  { %5373 = vmatprep.subr.bf16.mxu1 %v7996_v47  ;;  %5415 = vmatprep.subr.bf16.mxu0 %v7996_v47 }
 0x1fb   :  { %4363 = vmatmul.mubr.f32.vlgmr.msra.gmra.mrb[10].mxu1 %v6411_v2 }
 0x1fc   :  { %5375 = vmatpush3.bf16.msra.mxu1 %v6505_v21  ;;  %5417 = vmatpush3.bf16.msra.mxu0 %v8042_v35  ;;  %v1656_v35 = vand.u32 4294901760, %v6832_v6 }
 0x1fd   :  { %5376 = vmatprep.subr.bf16.mxu1 %v7996_v47  ;;  %5418 = vmatprep.subr.bf16.mxu0 %v7996_v47 }
 0x1fe   :  { %4432 = vmatprep.mubr.msk.f32.mxu1 %vm6108_vm1, %v7995_v59 }
 0x200   :  { %5378 = vmatpush3.bf16.msra.mxu1 %v6520_v18  ;;  %5420 = vmatpush3.bf16.msra.mxu0 %v8043_v36 }
 0x201   :  { %5379 = vmatprep.subr.bf16.mxu1 %v7996_v47  ;;  %5445 = vmatprep.subr.bf16.mxu0 %v7996_v47 }
 0x203   :  { %4468 = vmatmul.mubr.f32.vlgmr.msra.gmra.mrb[2].mxu0 %v6672_v3  ;;  %v90_v37 = vpop.xlane.xlu0 %89 }
 0x204   :  { %5952 = vtanh.f32 %v90_v37  ;;  %5381 = vmatpush3.bf16.msra.mxu1 %v6532_v61  ;;  %5447 = vmatpush3.bf16.msra.mxu0 %v6534_v34 }
 0x205   :  { %5382 = vmatprep.subr.bf16.mxu1 %v7996_v47  ;;  %5448 = vmatprep.subr.bf16.mxu0 %v7996_v47 }
 0x206   :  { %4537 = vmatprep.mubr.msk.f32.mxu0 %vm6108_vm1, %v7995_v59 }
 0x207   :  { %v94_v4 = vpop.xlane.xlu0 %93 }
 0x208   :  { %5954 = vtanh.f32 %v94_v4  ;;  %5384 = vmatpush3.bf16.msra.mxu1 %v8044_v20  ;;  %5450 = vmatpush3.bf16.msra.mxu0 %v8045_v27  ;;  %v92_v40 = vpop.xlane.xlu1 %91  ;;  %v6843_v4 = vsub.f32 %v6832_v6, %v1656_v35  ;;  %v8060_v27 = vld [vmem:[#allocation18_spill] sm:$0xff]  ;;  %v6954_v6 = vld [vmem:[#allocation8 + $0x1d0] sm:$0xff] }
 0x209   :  { %5956 = vtanh.f32 %v92_v40  ;;  %5385 = vmatprep.subr.bf16.mxu1 %v7996_v47  ;;  %5451 = vmatprep.subr.bf16.mxu0 %v7996_v47 }
 0x20b   :  { %v96_v2 = vpop.xlane.xlu0 %95 }
 0x20c   :  { %5958 = vtanh.f32 %v96_v2  ;;  %5387 = vmatpush3.bf16.msra.mxu1 %v8046_v0  ;;  %5453 = vmatpush3.bf16.msra.mxu0 %v8047_v1  ;;  %v8061_v2 = vld [vmem:[#allocation17_spill] sm:$0xff] }
 0x20d   :  { %5388 = vmatprep.subr.bf16.mxu1 %v7996_v47  ;;  %5454 = vmatprep.subr.bf16.mxu0 %v7996_v47 }
 0x20e   :  { %v5953_v28 = vpop.eup %5952 }
 0x20f   :  { %v101_v25 = vmul.f32 1.442695, %v5953_v28  ;;  %v1749_v28 = vand.u32 4294901760, %v6843_v4 }
 0x210   :  { %5390 = vmatpush3.bf16.msra.mxu1 %v8048_v42  ;;  %5456 = vmatpush3.bf16.msra.mxu0 %v8049_v46 }
 0x211   :  { %5391 = vmatprep.subr.bf16.mxu1 %v7996_v47  ;;  %5457 = vmatprep.subr.bf16.mxu0 %v7996_v47  ;;  %5960 = vpow2.f32 %v101_v25  ;;  %v1750_v46 = vsub.f32 %v6843_v4, %v1749_v28 }
 0x212   :  { %v5955_v22 = vpop.eup %5954 }
 0x213   :  { %v5957_v62 = vpop.eup %5956  ;;  %v105_v21 = vmul.f32 1.442695, %v5955_v22  ;;  %v1751_v22 = vand.u32 4294901760, %v1750_v46 }
 0x214   :  { %v103_v18 = vmul.f32 1.442695, %v5957_v62  ;;  %5393 = vmatpush3.bf16.msra.mxu1 %v6580_v52  ;;  %5459 = vmatpush3.bf16.msra.mxu0 %v6582_v60  ;;  %v8050_v52 = vld [vmem:[#allocation16_spill] sm:$0xff] }
 0x215   :  { %5394 = vmatprep.subr.bf16.mxu1 %v7996_v47  ;;  %5460 = vmatprep.subr.bf16.mxu0 %v7996_v47  ;;  %v119_v60 = vadd.s32 4294967288, %v8050_v52 }
 0x216   :  { %v5959_v61 = vpop.eup %5958  ;;  %5962 = vpow2.f32 %v103_v18  ;;  %v6862_v18 = vld [vmem:[#allocation8 + $0x198] sm:$0xff] }
 0x217   :  { %5964 = vpow2.f32 %v105_v21  ;;  %v107_v34 = vmul.f32 1.442695, %v5959_v61  ;;  %v6860_v21 = vld [vmem:[#allocation8 + $0x190] sm:$0xff] }
 0x218   :  { %5396 = vmatpush3.bf16.msra.mxu1 %v6590_v38  ;;  %5462 = vmatpush3.bf16.msra.mxu0 %v6592_v53  ;;  %v8052_v38 = vld [vmem:[#allocation15_spill] sm:$0xff] }
 0x219   :  { %5966 = vpow2.f32 %v107_v34  ;;  %5421 = vmatprep.subr.bf16.mxu1 %v7996_v47  ;;  %5463 = vmatprep.subr.bf16.mxu0 %v7996_v47  ;;  %v122_v19 = vsub.s32 %v119_v60, %v8052_v38  ;;  %v1662_v34 = vand.u32 4294901760, %v6860_v21 }
 0x21b   :  { %4433 = vmatmul.mubr.f32.vlgmr.msra.gmra.mrb[12].mxu1 %v6668_v7  ;;  %v6773_v53 = vpop.eup %5960  ;;  %v6869_v60 = vsub.f32 %v6860_v21, %v1662_v34 }
 0x21c   :  { %5423 = vmatpush3.bf16.msra.mxu1 %v8051_v30  ;;  %5465 = vmatpush3.bf16.msra.mxu0 %v6598_v31  ;;  %v117_v31 = vsub.s32 %v8050_v52, %v8052_v38  ;;  %v1665_v52 = vand.u32 4294901760, %v6862_v18  ;;  %v6877_v38 = vld [vmem:[#allocation8 + $0x1a0] sm:$0xff] }
 0x21d   :  { %5424 = vmatprep.subr.bf16.mxu1 %v7996_v47  ;;  %5466 = vmatprep.subr.bf16.mxu0 %v7996_v47 }
 0x21e   :  { %4502 = vmatprep.mubr.msk.f32.mxu1 %vm6108_vm1, %v7995_v59 }
 0x220   :  { %v6775_v11 = vpop.eup %5962  ;;  %5426 = vmatpush3.bf16.msra.mxu1 %v8053_v50  ;;  %5468 = vmatpush3.bf16.msra.mxu0 %v6605_v45  ;;  %v118_v45 = vrot.slane %v6773_v53, %v117_v31 }
 0x221   :  { %v6781_v39 = vpop.eup %5964  ;;  %5427 = vmatprep.subr.bf16.mxu1 %v7996_v47  ;;  %5493 = vmatprep.subr.bf16.mxu0 %v7996_v47  ;;  %v123_v51 = vrot.slane %v6775_v11, %v122_v19 }
 0x222   :  { %v129_v54 = vrot.slane %v6781_v39, %v117_v31 }
 0x223   :  { %v6786_v41 = vpop.eup %5966  ;;  %4538 = vmatmul.mubr.f32.vlgmr.msra.gmra.mrb[4].mxu0 %v6668_v7  ;;  %v125_v14 = vsel %vm124_vm4, %v123_v51, %v118_v45  ;;  %v1668_v51 = vand.u32 4294901760, %v6877_v38 }
 0x224   :  { %5429 = vmatpush3.bf16.msra.mxu1 %v8054_v13  ;;  %v133_v55 = vrot.slane %v6786_v41, %v122_v19  ;;  %4607 = vmatprep.mubr.msk.f32.mxu0 %vm6108_vm1, %v7995_v59  ;;  %v6879_v19 = vld [vmem:[#allocation8 + $0x1a8] sm:$0xff] }
 0x225   :  { %5430 = vmatprep.subr.bf16.mxu1 %v7996_v47 }
 0x226   :  { %v134_v33 = vsel %vm124_vm4, %v133_v55, %v129_v54 }
 0x227   :  { %v136_v43 = vsel %vm135_vm2, %v134_v33, %v125_v14 }
 0x228   :  { %5432 = vmatpush3.bf16.msra.mxu1 %v8055_v15  ;;  %v139_v16 = vsel %vm138_vm5, %v136_v43, 0.0 }
 0x229   :  { %140 = vadd.xlane.f32.xlu1 %v139_v16  ;;  %5433 = vmatprep.subr.bf16.mxu1 %v7996_v47 }
 0x22c   :  { %5435 = vmatpush3.bf16.msra.mxu1 %v8056_v24 }
 0x22d   :  { %5436 = vmatprep.subr.bf16.mxu1 %v7996_v47 }
 0x22e   :  { %v394_v57 = vpop.f32.mrb[0].mxu1 }
 0x22f   :  { %v4189_v56 = vpop.f32.mrb[1].mxu1 }
 0x230   :  { %5438 = vmatpush3.bf16.msra.mxu1 %v8057_v44 }
 0x231   :  { %5439 = vmatprep.subr.bf16.mxu1 %v7996_v47 }
 0x234   :  { %5441 = vmatpush3.bf16.msra.mxu1 %v8058_v58 }
 0x235   :  { %5442 = vmatprep.subr.bf16.mxu1 %v7996_v47 }
 0x238   :  { %5444 = vmatpush3.bf16.msra.mxu1 %v8059_v48 }
 0x239   :  { %5469 = vmatprep.subr.bf16.mxu1 %v7996_v47 }
 0x23b   :  { %4503 = vmatmul.mubr.f32.vlgmr.msra.gmra.mrb[14].mxu1 %v1035_v9 }
 0x23c   :  { %5471 = vmatpush3.bf16.msra.mxu1 %v8051_v30  ;;  %4572 = vmatprep.mubr.msk.f32.mxu1 %vm6108_vm1, %v7995_v59  ;;  %v6874_v30 = vsub.f32 %v6862_v18, %v1665_v52 }
 0x23d   :  { %5472 = vmatprep.subr.bf16.mxu1 %v7996_v47 }
 0x23e   :  { %v1770_v31 = vand.u32 4294901760, %v6874_v30 }
 0x240   :  { %5474 = vmatpush3.bf16.msra.mxu1 %v8053_v50  ;;  %v1763_v50 = vand.u32 4294901760, %v6869_v60  ;;  %v1771_v14 = vsub.f32 %v6874_v30, %v1770_v31 }
 0x241   :  { %5475 = vmatprep.subr.bf16.mxu1 %v7996_v47 }
 0x242   :  { %v1764_v55 = vsub.f32 %v6869_v60, %v1763_v50 }
 0x244   :  { %5477 = vmatpush3.bf16.msra.mxu1 %v8054_v13  ;;  %v1671_v13 = vand.u32 4294901760, %v6879_v19 }
 0x245   :  { %5478 = vmatprep.subr.bf16.mxu1 %v7996_v47 }
 0x246   :  { %v6901_v16 = vsub.f32 %v6879_v19, %v1671_v13  ;;  %v1649_v19 = vld [vmem:[#allocation8 + $0x1f8] sm:$0xff] }
 0x248   :  { %5480 = vmatpush3.bf16.msra.mxu1 %v8055_v15  ;;  %v6896_v15 = vsub.f32 %v6877_v38, %v1668_v51 }
 0x249   :  { %5481 = vmatprep.subr.bf16.mxu1 %v7996_v47 }
 0x24c   :  { %5483 = vmatpush3.bf16.msra.mxu1 %v8056_v24  ;;  %v6903_v24 = vld [vmem:[#allocation8 + $0x1b0] sm:$0xff] }
 0x24d   :  { %5484 = vmatprep.subr.bf16.mxu1 %v7996_v47 }
 0x24e   :  { %v545_v26 = vpop.f32.mrb[2].mxu1 }
 0x24f   :  { %v546_v49 = vadd.f32 %v545_v26, %v394_v57  ;;  %v4224_v8 = vpop.f32.mrb[3].mxu1  ;;  %v6905_v57 = vld [vmem:[#allocation8 + $0x1b8] sm:$0xff]  ;;  %v1784_v26 = vand.u32 4294901760, %v6901_v16 }
 0x250   :  { %5486 = vmatpush3.bf16.msra.mxu1 %v8057_v44  ;;  %v1765_v44 = vand.u32 4294901760, %v1764_v55  ;;  %v1674_v8 = vand.u32 4294901760, %v6903_v24 }
 0x251   :  { %5487 = vmatprep.subr.bf16.mxu1 %v7996_v47 }
 0x254   :  { %5489 = vmatpush3.bf16.msra.mxu1 %v8058_v58 }
 0x255   :  { %5490 = vmatprep.subr.bf16.mxu1 %v7996_v47 }
 0x258   :  { %5492 = vmatpush3.bf16.msra.mxu1 %v8059_v48  ;;  %v1777_v48 = vand.u32 4294901760, %v6896_v15 }
 0x259   :  { %5517 = vmatprep.subr.bf16.mxu1 %v7996_v47 }
 0x25b   :  { %4573 = vmatmul.mubr.f32.vlgmr.msra.gmra.mrb[16].mxu1 %v6668_v7  ;;  %v1659_v7 = vand.u32 4294901760, %v6834_v32 }
 0x25c   :  { %4642 = vmatprep.mubr.msk.f32.mxu1 %vm6108_vm1, %v7995_v59 }
 0x25d   :  { %v6848_v20 = vsub.f32 %v6834_v32, %v1659_v7  ;;  %v6956_v32 = vld [vmem:[#allocation8 + $0x1d8] sm:$0xff] }
 0x25f   :  { %v1756_v42 = vand.u32 4294901760, %v6848_v20 }
 0x261   :  { %v1757_v25 = vsub.f32 %v6848_v20, %v1756_v42 }
 0x263   :  { %v1758_v62 = vand.u32 4294901760, %v1757_v25 }
 0x265   :  { %v5518_v61 = vpack.c.bf16 %v1758_v62, %v1751_v22 }
 0x267   :  { %5519 = vmatpush3.bf16.msra.mxu1 %v5518_v61 }
 0x268   :  { %5520 = vmatprep.subr.bf16.mxu1 %v7996_v47 }
 0x26e   :  { %v649_v5 = vpop.f32.mrb[4].mxu1 }
 0x26f   :  { %v650_v3 = vadd.f32 %v649_v5, %v546_v49  ;;  %v4259_v9 = vpop.f32.mrb[5].mxu1  ;;  %v1677_v5 = vand.u32 4294901760, %v6905_v57 }
 0x270   :  { %v6918_v9 = vld [vmem:[#allocation8 + $0x1c0] sm:$0xff] }
 0x28e   :  { %v738_v10 = vpop.f32.mrb[6].mxu1 }
 0x28f   :  { %v739_v63 = vadd.f32 %v738_v10, %v650_v3  ;;  %v4294_v12 = vpop.f32.mrb[7].mxu1  ;;  %v1778_v3 = vsub.f32 %v6896_v15, %v1777_v48  ;;  %v6920_v10 = vld [vmem:[#allocation8 + $0x1c8] sm:$0xff] }
 0x290   :  { %v6930_v12 = vsub.f32 %v6905_v57, %v1677_v5 }
 0x292   :  { %v7962_v46 = vand.u32 4294901760, %v6930_v12 }
 0x294   :  { %v1799_v61 = vsub.f32 %v6930_v12, %v7962_v46 }
 0x2ae   :  { %v857_v17 = vpop.f32.mrb[8].mxu1 }
 0x2af   :  { %v6830_v23 = vadd.f32 %v857_v17, %v739_v63  ;;  %v4329_v29 = vpop.f32.mrb[9].mxu1  ;;  %v6925_v63 = vsub.f32 %v6903_v24, %v1674_v8  ;;  %v1680_v17 = vand.u32 4294901760, %v6918_v9 }
 0x2b0   :  { %v1683_v29 = vand.u32 4294901760, %v6920_v10 }
 0x2b1   :  { %v6947_v25 = vsub.f32 %v6918_v9, %v1680_v17 }
 0x2b2   :  { %v6952_v22 = vsub.f32 %v6920_v10, %v1683_v29 }
 0x2b6   :  { %v141_v36 = vpop.xlane.xlu1 %140  ;;  %v6838_v37 = vpop.f32.mrb[0].mxu0 }
 0x2b7   :  { %v146_v40 = vrot.slane %v141_v36, %v8060_v27  ;;  %v150_v0 = vrot.slane %v141_v36, %v8061_v2  ;;  %v4399_v1 = vpop.f32.mrb[1].mxu0 }
 0x2b8   :  { %v1791_v1 = vand.u32 4294901760, %v6925_v63 }
 0x2b9   :  { %5968 = vrcp.f32 %v146_v40  ;;  %v1779_v40 = vand.u32 4294901760, %v1778_v3 }
 0x2ba   :  { %5970 = vrcp.f32 %v150_v0  ;;  %v6940_v0 = vpack.c.bf16 %v1659_v7, %v1656_v35  ;;  %v8062_v35 = vmov 1   ;;  %v1792_v62 = vsub.f32 %v6925_v63, %v1791_v1 }
 0x2bc   :  { %5495 = vmatpush3.bf16.msra.mxu0 %v6940_v0 }
 0x2bd   :  { %5496 = vmatprep.subr.bf16.mxu0 %v7996_v47 }
 0x2c3   :  { %v5969_v45 = vpop.eup %5968 }
 0x2c4   :  { %v5971_v54 = vpop.eup %5970  ;;  %v154_v56 = vmul.f32 %v5969_v45, %v6773_v53  ;;  %v1785_v53 = vsub.f32 %v6901_v16, %v1784_v26  ;;  %v155_v27 = vmul.f32 %v5969_v45, %v6775_v11  ;;  %v7961_v45 = vand.u32 4294901760, %v6947_v25 }
 0x2c5   :  { %v158_v33 = vmul.f32 %v5971_v54, %v6786_v41  ;;  %v157_v43 = vmul.f32 %v5971_v54, %v6781_v39  ;;  %v1772_v41 = vand.u32 4294901760, %v1771_v14  ;;  %v1686_v54 = vand.u32 4294901760, %v6954_v6 }
 0x2c6   :  { %v159_v36 = vadd.f32 1e-10, %v154_v56  ;;  %v1786_v2 = vand.u32 4294901760, %v1785_v53  ;;  %v1689_v56 = vand.u32 4294901760, %v6956_v32 }
 0x2c7   :  { %v162_v58 = vadd.f32 1e-10, %v158_v33  ;;  %v161_v39 = vadd.f32 1e-10, %v157_v43  ;;  %v5521_v49 = vpack.c.bf16 %v1772_v41, %v1765_v44  ;;  %v160_v33 = vadd.f32 1e-10, %v155_v27 }
 0x2c8   :  { %v5524_v11 = vpack.c.bf16 %v1786_v2, %v1779_v40  ;;  %v7960_v43 = vand.u32 4294901760, %v6952_v22  ;;  %v6977_v44 = vpack.c.bf16 %v1665_v52, %v1662_v34  ;;  %v1793_v41 = vand.u32 4294901760, %v1792_v62  ;;  %v6998_v34 = vld [vmem:[#allocation8 + $0x1e0] sm:$0xff]  ;;  %v1647_v52 = vld [vmem:[#allocation8 + $0x1e8] sm:$0xff] }
 0x2c9   :  { %180 = vperm.xlu1 %5949, %v162_v58   ;;  %175 = vperm.xlu0 %5950, %v161_v39   ;;  %v1800_v58 = vand.u32 4294901760, %v1799_v61  ;;  %v6991_v21 = vsub.f32 %v6954_v6, %v1686_v54  ;;  %v6996_v18 = vsub.f32 %v6956_v32, %v1689_v56  ;;  %v1692_v53 = vand.u32 4294901760, %v6998_v34 }
 0x2ca   :  { %5522 = vmatpush3.bf16.msra.mxu1 %v5521_v49  ;;  %v1813_v49 = vsub.f32 %v6952_v22, %v7960_v43  ;;  %5498 = vmatpush3.bf16.msra.mxu0 %v6977_v44  ;;  %v7067_v10 = vpack.c.bf16 %v1689_v56, %v1686_v54  ;;  %v5542_v32 = vpack.c.bf16 %v6848_v20, %v6843_v4 }
 0x2cb   :  { %5523 = vmatprep.subr.bf16.mxu1 %v7996_v47  ;;  %5499 = vmatprep.subr.bf16.mxu0 %v7996_v47  ;;  %v7959_v40 = vand.u32 4294901760, %v6991_v21  ;;  %v7958_v2 = vand.u32 4294901760, %v6996_v18  ;;  %v5593_v4 = vpack.c.bf16 %v1770_v31, %v1763_v50  ;;  %v7197_v50 = vld [vmem:[#allocation8 + $0x128] sm:$0xff] }
 0x2cc   :  { %v1814_v27 = vand.u32 4294901760, %v1813_v49 }
 0x2cd   :  { %165 = vperm.xlu1 %5949, %v159_v36   ;;  %5951 = vset.pattern.permute.xlu0 %v8062_v35  ;;  %v1695_v36 = vand.u32 4294901760, %v1647_v52  ;;  %v7012_v35 = vsub.f32 %v6998_v34, %v1692_v53  ;;  %v1820_v61 = vsub.f32 %v6991_v21, %v7959_v40  ;;  %v1827_v38 = vsub.f32 %v6996_v18, %v7958_v2 }
 0x2ce   :  { %v944_v7 = vpop.f32.mrb[10].mxu1  ;;  %5525 = vmatpush3.bf16.msra.mxu1 %v5524_v11  ;;  %v7009_v11 = vpack.c.bf16 %v1671_v13, %v1668_v51  ;;  %v7031_v34 = vpack.c.bf16 %v1677_v5, %v1674_v8 }
 0x2cf   :  { %v945_v55 = vadd.f32 %v944_v7, %v6830_v23  ;;  %v4364_v14 = vpop.f32.mrb[11].mxu1  ;;  %5526 = vmatprep.subr.bf16.mxu1 %v7996_v47  ;;  %v1806_v23 = vsub.f32 %v6947_v25, %v7961_v45  ;;  %v7014_v7 = vsub.f32 %v1647_v52, %v1695_v36  ;;  %v7957_v13 = vand.u32 4294901760, %v7012_v35  ;;  %v5978_v45 = vld [vmem:[#allocation7] sm:$0xff] }
 0x2d0   :  { %5501 = vmatpush3.bf16.msra.mxu0 %v7009_v11  ;;  %v1828_v49 = vand.u32 4294901760, %v1827_v38 }
 0x2d1   :  { %170 = vperm.xlu1 %5949, %v160_v33   ;;  %v6983_v39 = vadd.f32 %v6838_v37, %v945_v55  ;;  %v5527_v37 = vpack.c.bf16 %v1800_v58, %v1793_v41  ;;  %v1807_v3 = vand.u32 4294901760, %v1806_v23  ;;  %v1648_v55 = vld [vmem:[#allocation8 + $0x1f0] sm:$0xff]  ;;  %v7956_v14 = vand.u32 4294901760, %v7014_v7  ;;  %5502 = vmatprep.subr.bf16.mxu0 %v7996_v47 }
 0x2d2   :  { %v1698_v33 = vand.u32 4294901760, %v1648_v55  ;;  %v1701_v41 = vand.u32 4294901760, %v1649_v19  ;;  %v1821_v23 = vand.u32 4294901760, %v1820_v61  ;;  %v1834_v52 = vsub.f32 %v7012_v35, %v7957_v13 }
 0x2d3   :  { %5528 = vmatpush3.bf16.msra.mxu1 %v5527_v37  ;;  %v5530_v62 = vpack.c.bf16 %v1814_v27, %v1807_v3  ;;  %v1841_v37 = vsub.f32 %v7014_v7, %v7956_v14  ;;  %v7052_v61 = vpack.c.bf16 %v1683_v29, %v1680_v17  ;;  %v7072_v29 = vpack.c.bf16 %v1695_v36, %v1692_v53 }
 0x2d4   :  { %5529 = vmatprep.subr.bf16.mxu1 %v7996_v47  ;;  %v7039_v3 = vsub.f32 %v1648_v55, %v1698_v33  ;;  %v5533_v27 = vpack.c.bf16 %v1828_v49, %v1821_v23  ;;  %5504 = vmatpush3.bf16.msra.mxu0 %v7031_v34  ;;  %v1835_v24 = vand.u32 4294901760, %v1834_v52  ;;  %v7077_v6 = vpack.c.bf16 %v1701_v41, %v1698_v33 }
 0x2d5   :  { %v1842_v57 = vand.u32 4294901760, %v1841_v37  ;;  %5505 = vmatprep.subr.bf16.mxu0 %v7996_v47  ;;  %v5545_v36 = vpack.c.bf16 %v6874_v30, %v6869_v60  ;;  %v5548_v49 = vpack.c.bf16 %v6901_v16, %v6896_v15  ;;  %v5551_v52 = vpack.c.bf16 %v6930_v12, %v6925_v63  ;;  %v7195_v30 = vld [vmem:[#allocation8 + $0x120] sm:$0xff] }
 0x2d6   :  { %v1294_v51 = vpop.f32.mrb[2].mxu0  ;;  %v7955_v8 = vand.u32 4294901760, %v7039_v3  ;;  %v5554_v37 = vpack.c.bf16 %v6952_v22, %v6947_v25  ;;  %v5596_v60 = vpack.c.bf16 %v1784_v26, %v1777_v48  ;;  %v2309_v48 = vand.u32 4294901760, %v7195_v30 }
 0x2d7   :  { %v4469_v58 = vpop.f32.mrb[3].mxu0  ;;  %5531 = vmatpush3.bf16.msra.mxu1 %v5530_v62  ;;  %v7042_v62 = vsub.f32 %v1649_v19, %v1701_v41  ;;  %v5536_v38 = vpack.c.bf16 %v1842_v57, %v1835_v24  ;;  %v2312_v26 = vand.u32 4294901760, %v7197_v50 }
 0x2d8   :  { %5532 = vmatprep.subr.bf16.mxu1 %v7996_v47  ;;  %v1848_v55 = vsub.f32 %v7039_v3, %v7955_v8  ;;  %5507 = vmatpush3.bf16.msra.mxu0 %v7052_v61 }
 0x2d9   :  { %v7954_v5 = vand.u32 4294901760, %v7042_v62  ;;  %5508 = vmatprep.subr.bf16.mxu0 %v7996_v47 }
 0x2da   :  { %v1849_v58 = vand.u32 4294901760, %v1848_v55 }
 0x2db   :  { %5534 = vmatpush3.bf16.msra.mxu1 %v5533_v27  ;;  %v1855_v19 = vsub.f32 %v7042_v62, %v7954_v5  ;;  %v5557_v27 = vpack.c.bf16 %v6996_v18, %v6991_v21 }
 0x2dc   :  { %5535 = vmatprep.subr.bf16.mxu1 %v7996_v47  ;;  %5510 = vmatpush3.bf16.msra.mxu0 %v7067_v10 }
 0x2dd   :  { %v1856_v9 = vand.u32 4294901760, %v1855_v19  ;;  %5511 = vmatprep.subr.bf16.mxu0 %v7996_v47 }
 0x2df   :  { %5537 = vmatpush3.bf16.msra.mxu1 %v5536_v38  ;;  %v5539_v17 = vpack.c.bf16 %v1856_v9, %v1849_v58 }
 0x2e0   :  { %5538 = vmatprep.subr.bf16.mxu1 %v7996_v47  ;;  %5513 = vmatpush3.bf16.msra.mxu0 %v7072_v29 }
 0x2e1   :  { %5514 = vmatprep.subr.bf16.mxu0 %v7996_v47 }
 0x2e3   :  { %5540 = vmatpush3.bf16.msra.mxu1 %v5539_v17 }
 0x2e4   :  { %5565 = vmatprep.subr.bf16.mxu1 %v7996_v47  ;;  %5516 = vmatpush3.bf16.msra.mxu0 %v7077_v6 }
 0x2e5   :  { %5541 = vmatprep.subr.bf16.mxu0 %v7996_v47 }
 0x2ee   :  { %v1190_v54 = vpop.f32.mrb[12].mxu1 }
 0x2ef   :  { %v1191_v56 = vadd.f32 %v1190_v54, %v6983_v39  ;;  %v4434_v53 = vpop.f32.mrb[13].mxu1  ;;  %v5560_v39 = vpack.c.bf16 %v7014_v7, %v7012_v35 }
 0x2f1   :  { %v1295_v23 = vadd.f32 %v1294_v51, %v1191_v56  ;;  %v5563_v51 = vpack.c.bf16 %v7042_v62, %v7039_v3  ;;  %v5976_v56 = vld [vmem:[#allocation7 + $0x18] sm:$0xff] }
 0x2f6   :  { %v1502_v33 = vpop.f32.mrb[4].mxu0 }
 0x2f7   :  { %v4539_v41 = vpop.f32.mrb[5].mxu0 }
 0x2f8   :  { %v5977_v41 = vld [vmem:[#allocation7 + $0x10] sm:$0xff] }
 0x30e   :  { %v1383_v24 = vpop.f32.mrb[14].mxu1 }
 0x30f   :  { %v1384_v57 = vadd.f32 %v1383_v24, %v1295_v23  ;;  %v4504_v38 = vpop.f32.mrb[15].mxu1  ;;  %v5979_v23 = vld [vmem:[#allocation7 + $0x8] sm:$0xff] }
 0x310   :  { %v3641_v38 = vld [vmem:[%s7900_s4 + $0x1] ss:$0 sm:$0xff] }
 0x311   :  { %v1503_v55 = vadd.f32 %v1502_v33, %v1384_v57 }
 0x32e   :  { %v1589_v19 = vpop.f32.mrb[16].mxu1 }
 0x32f   :  { %v1590_v58 = vadd.f32 %v1589_v19, %v1503_v55  ;;  %v4574_v9 = vpop.f32.mrb[17].mxu1 }
 0x331   :  { %v1598_v9 = vadd.f32 %v3641_v38, %v1590_v58 }
 0x348   :  { %v181_v17 = vpop.permute.xlu1 %180  ;;  %v176_v54 = vpop.permute.xlu0 %175 }
 0x349   :  { %v186_v53 = vmul.f32 %v5976_v56, %v181_v17  ;;  %v185_v5 = vmul.f32 %v5977_v41, %v176_v54  ;;  %v1600_v56 = vrot.slane %v1598_v9, 1 }
 0x34b   :  { %v194_v8 = vadd.f32 %v186_v53, %v185_v5 }
 0x34c   :  { %v166_v14 = vpop.permute.xlu1 %165 }
 0x34d   :  { %v195_v13 = vrot.slane %v194_v8, 4  ;;  %v183_v46 = vmul.f32 %v5978_v45, %v166_v14 }
 0x34f   :  { %v196_v2 = vadd.f32 %v195_v13, %v194_v8 }
 0x350   :  { %v171_v40 = vpop.permute.xlu1 %170 }
 0x351   :  { %v197_v43 = vrot.slane %v196_v2, 2  ;;  %v184_v24 = vmul.f32 %v5979_v23, %v171_v40 }
 0x353   :  { %v198_v33 = vadd.f32 %v197_v43, %v196_v2  ;;  %v187_v57 = vadd.f32 %v184_v24, %v183_v46 }
 0x355   :  { %v199_v55 = vrot.slane %v198_v33, 1  ;;  %v188_v19 = vrot.slane %v187_v57, 4 }
 0x357   :  { %v189_v17 = vadd.f32 %v188_v19, %v187_v57  ;;  %v200_v5 = vadd.f32 %v199_v55, %v198_v33 }
 0x359   :  { %v190_v54 = vrot.slane %v189_v17, 2  ;;  %v1606_v8 = vsub.f32 %v200_v5, %v1600_v56  ;;  %v1604_v41 = vmul.f32 %v1600_v56, %v200_v5 }
 0x35b   :  { %v191_v13 = vadd.f32 %v190_v54, %v189_v17  ;;  %v1652_v40 = vrot.slane %v1606_v8, 7  ;;  %v1609_v2 = vrot.slane %v1604_v41, 7  ;;  %v8065_v17 = vand.u32 4294901760, %v6952_v22 }
 0x35d   :  { %v192_v53 = vrot.slane %v191_v13, 1 }
 0x35f   :  { %v193_v45 = vadd.f32 %v192_v53, %v191_v13  ;;  %v7264_v53 = vld [vmem:[#allocation8 + $0x140] sm:$0xff] }
 0x361   :  { %v1605_v43 = vsub.f32 %v193_v45, %v1598_v9  ;;  %v1603_v46 = vmul.f32 %v1598_v9, %v193_v45  ;;  %v8064_v9 = vand.u32 4294901760, %v6947_v25  ;;  %v7266_v25 = vld [vmem:[#allocation8 + $0x148] sm:$0xff] }
 0x363   :  { %v7102_v14 = vsel %vm135_vm2, %v1609_v2, %v1603_v46  ;;  %v1653_v23 = vsel %vm135_vm2, %v1652_v40, %v1605_v43  ;;  %v5602_v5 = vpack.c.bf16 %v8065_v17, %v8064_v9  ;;  %v8066_v40 = vand.u32 4294901760, %v6991_v21 }
 0x364   :  { %v1613_v58 = vsel %vm1612_vm6, %v7102_v14, 0.0  ;;  %v7106_v24 = vand.u32 4294901760, %v1653_v23  ;;  %v8067_v43 = vand.u32 4294901760, %v6996_v18  ;;  %v2321_v2 = vand.u32 4294901760, %v7264_v53  ;;  %v7297_v18 = vld [vmem:[#allocation8 + $0x158] sm:$0xff] }
 0x365   :  { %1614 = vadd.xlane.f32.xlu1 %v1613_v58  ;;  %v2330_v9 = vand.u32 4294901760, %v7297_v18  ;;  %v8068_v17 = vand.u32 4294901760, %v7012_v35 }
 0x366   :  { %v1737_v33 = vsub.f32 %v1653_v23, %v7106_v24  ;;  %4643 = vmatmul.mubr.f32.vlgmr.msra.gmra.mrb[18].mxu1 %v7106_v24  ;;  %v5605_v46 = vpack.c.bf16 %v8067_v43, %v8066_v40  ;;  %v2324_v23 = vand.u32 4294901760, %v7266_v25 }
 0x367   :  { %5567 = vmatpush3.bf16.msra.mxu1 %v6940_v0  ;;  %4712 = vmatprep.mubr.msk.f32.mxu1 %vm6108_vm1, %v7995_v59 }
 0x368   :  { %5568 = vmatprep.subr.bf16.mxu1 %v7996_v47  ;;  %v1738_v57 = vand.u32 4294901760, %v1737_v33 }
 0x36a   :  { %v1739_v38 = vsub.f32 %v1737_v33, %v1738_v57 }
 0x36b   :  { %5570 = vmatpush3.bf16.msra.mxu1 %v6977_v44 }
 0x36c   :  { %5571 = vmatprep.subr.bf16.mxu1 %v7996_v47  ;;  %v1740_v55 = vand.u32 4294901760, %v1739_v38  ;;  %v7295_v38 = vld [vmem:[#allocation8 + $0x150] sm:$0xff] }
 0x36e   :  { %4608 = vmatmul.mubr.f32.vlgmr.msra.gmra.mrb[6].mxu0 %v1740_v55 }
 0x36f   :  { %5543 = vmatpush3.bf16.msra.mxu0 %v5542_v32  ;;  %5573 = vmatpush3.bf16.msra.mxu1 %v7009_v11  ;;  %v5590_v32 = vpack.c.bf16 %v1756_v42, %v1749_v28  ;;  %v7185_v42 = vld [vmem:[#allocation8 + $0x110] sm:$0xff] }
 0x370   :  { %5544 = vmatprep.subr.bf16.mxu0 %v7996_v47  ;;  %5574 = vmatprep.subr.bf16.mxu1 %v7996_v47  ;;  %v2303_v15 = vand.u32 4294901760, %v7185_v42 }
 0x371   :  { %4677 = vmatprep.mubr.msk.f32.mxu0 %vm6108_vm1, %v7995_v59 }
 0x373   :  { %5546 = vmatpush3.bf16.msra.mxu0 %v5545_v36  ;;  %5576 = vmatpush3.bf16.msra.mxu1 %v7031_v34  ;;  %v7174_v36 = vld [vmem:[#allocation8 + $0x108] sm:$0xff] }
 0x374   :  { %5547 = vmatprep.subr.bf16.mxu0 %v7996_v47  ;;  %5577 = vmatprep.subr.bf16.mxu1 %v7996_v47  ;;  %v2300_v28 = vand.u32 4294901760, %v7174_v36 }
 0x377   :  { %5549 = vmatpush3.bf16.msra.mxu0 %v5548_v49  ;;  %5579 = vmatpush3.bf16.msra.mxu1 %v7052_v61 }
 0x378   :  { %5550 = vmatprep.subr.bf16.mxu0 %v7996_v47  ;;  %5580 = vmatprep.subr.bf16.mxu1 %v7996_v47 }
 0x37b   :  { %5552 = vmatpush3.bf16.msra.mxu0 %v5551_v52  ;;  %5582 = vmatpush3.bf16.msra.mxu1 %v7067_v10  ;;  %v7220_v52 = vld [vmem:[#allocation8 + $0x130] sm:$0xff] }
 0x37c   :  { %5553 = vmatprep.subr.bf16.mxu0 %v7996_v47  ;;  %5583 = vmatprep.subr.bf16.mxu1 %v7996_v47 }
 0x37f   :  { %5555 = vmatpush3.bf16.msra.mxu0 %v5554_v37  ;;  %5585 = vmatpush3.bf16.msra.mxu1 %v7072_v29  ;;  %v7222_v37 = vld [vmem:[#allocation8 + $0x138] sm:$0xff] }
 0x380   :  { %5556 = vmatprep.subr.bf16.mxu0 %v7996_v47  ;;  %5586 = vmatprep.subr.bf16.mxu1 %v7996_v47  ;;  %v2318_v19 = vand.u32 4294901760, %v7222_v37 }
 0x382   :  { %v7280_v45 = vsub.f32 %v7222_v37, %v2318_v19 }
 0x383   :  { %5558 = vmatpush3.bf16.msra.mxu0 %v5557_v27  ;;  %5588 = vmatpush3.bf16.msra.mxu1 %v7077_v6 }
 0x384   :  { %5559 = vmatprep.subr.bf16.mxu0 %v7996_v47  ;;  %5613 = vmatprep.subr.bf16.mxu1 %v7996_v47 }
 0x386   :  { %4713 = vmatmul.mubr.f32.vlgmr.msra.gmra.mrb[20].mxu1 %v1738_v57 }
 0x387   :  { %5561 = vmatpush3.bf16.msra.mxu0 %v5560_v39  ;;  %5615 = vmatpush3.bf16.msra.mxu1 %v6940_v0  ;;  %v7172_v0 = vld [vmem:[#allocation8 + $0x100] sm:$0xff] }
 0x388   :  { %5562 = vmatprep.subr.bf16.mxu0 %v7996_v47  ;;  %5616 = vmatprep.subr.bf16.mxu1 %v7996_v47  ;;  %v2297_v20 = vand.u32 4294901760, %v7172_v0 }
 0x389   :  { %4782 = vmatprep.mubr.msk.f32.mxu1 %vm6108_vm1, %v7995_v59 }
 0x38a   :  { %v7203_v31 = vsub.f32 %v7172_v0, %v2297_v20 }
 0x38b   :  { %5564 = vmatpush3.bf16.msra.mxu0 %v5563_v51  ;;  %5618 = vmatpush3.bf16.msra.mxu1 %v6977_v44  ;;  %v7187_v44 = vld [vmem:[#allocation8 + $0x118] sm:$0xff]  ;;  %v7230_v51 = vsub.f32 %v7185_v42, %v2303_v15 }
 0x38c   :  { %5589 = vmatprep.subr.bf16.mxu0 %v7996_v47  ;;  %5619 = vmatprep.subr.bf16.mxu1 %v7996_v47  ;;  %v2306_v16 = vand.u32 4294901760, %v7187_v44  ;;  %v2390_v27 = vand.u32 4294901760, %v7203_v31 }
 0x38d   :  { %v7968_v13 = vand.u32 4294901760, %v7230_v51 }
 0x38e   :  { %4678 = vmatmul.mubr.f32.vlgmr.msra.gmra.mrb[8].mxu0 %v1737_v33  ;;  %v7235_v63 = vsub.f32 %v7187_v44, %v2306_v16  ;;  %v2391_v54 = vsub.f32 %v7203_v31, %v2390_v27 }
 0x38f   :  { %5591 = vmatpush3.bf16.msra.mxu0 %v5590_v32  ;;  %5621 = vmatpush3.bf16.msra.mxu1 %v7009_v11  ;;  %v7208_v11 = vsub.f32 %v7174_v36, %v2300_v28  ;;  %v2405_v57 = vsub.f32 %v7230_v51, %v7968_v13  ;;  %v7361_v13 = vld [vmem:[#allocation8 + $0x178] sm:$0xff] }
 0x390   :  { %5592 = vmatprep.subr.bf16.mxu0 %v7996_v47  ;;  %5622 = vmatprep.subr.bf16.mxu1 %v7996_v47  ;;  %v7965_v8 = vand.u32 4294901760, %v7235_v63  ;;  %v2392_v58 = vand.u32 4294901760, %v2391_v54 }
 0x391   :  { %4747 = vmatprep.mubr.msk.f32.mxu0 %vm6108_vm1, %v7995_v59  ;;  %v2397_v39 = vand.u32 4294901760, %v7208_v11  ;;  %v2406_v40 = vand.u32 4294901760, %v2405_v57  ;;  %v7349_v57 = vsub.f32 %v7297_v18, %v2330_v9 }
 0x392   :  { %v2412_v21 = vsub.f32 %v7235_v63, %v7965_v8 }
 0x393   :  { %5594 = vmatpush3.bf16.msra.mxu0 %v5593_v4  ;;  %5624 = vmatpush3.bf16.msra.mxu1 %v7031_v34  ;;  %v8063_v34 = vand.u32 4294901760, %v6930_v12  ;;  %v7242_v12 = vsub.f32 %v7195_v30, %v2309_v48  ;;  %v2398_v56 = vsub.f32 %v7208_v11, %v2397_v39  ;;  %v7966_v4 = vand.u32 4294901760, %v7280_v45 }
 0x394   :  { %5595 = vmatprep.subr.bf16.mxu0 %v7996_v47  ;;  %5625 = vmatprep.subr.bf16.mxu1 %v7996_v47  ;;  %v2413_v43 = vand.u32 4294901760, %v2412_v21  ;;  %v8070_v21 = vand.u32 4294901760, %v7039_v3  ;;  %v7367_v3 = vpack.c.bf16 %v2300_v28, %v2297_v20  ;;  %v2467_v36 = vand.u32 4294901760, %v7349_v57 }
 0x395   :  { %v5599_v49 = vpack.c.bf16 %v8063_v34, %v1791_v1  ;;  %v7247_v1 = vsub.f32 %v7197_v50, %v2312_v26  ;;  %v7964_v22 = vand.u32 4294901760, %v7242_v12  ;;  %v2399_v33 = vand.u32 4294901760, %v2398_v56 }
 0x396   :  { %v7317_v34 = vsub.f32 %v7266_v25, %v2324_v23 }
 0x397   :  { %5597 = vmatpush3.bf16.msra.mxu0 %v5596_v60  ;;  %5627 = vmatpush3.bf16.msra.mxu1 %v7052_v61  ;;  %v2315_v61 = vand.u32 4294901760, %v7220_v52  ;;  %v7312_v60 = vsub.f32 %v7264_v53, %v2321_v2  ;;  %v5662_v56 = vpack.c.bf16 %v2399_v33, %v2392_v58 }
 0x398   :  { %5598 = vmatprep.subr.bf16.mxu0 %v7996_v47  ;;  %5628 = vmatprep.subr.bf16.mxu1 %v7996_v47  ;;  %v2453_v58 = vand.u32 4294901760, %v7317_v34 }
 0x399   :  { %v7275_v41 = vsub.f32 %v7220_v52, %v2315_v61  ;;  %v7460_v52 = vpack.c.bf16 %v2324_v23, %v2321_v2 }
 0x39b   :  { %5600 = vmatpush3.bf16.msra.mxu0 %v5599_v49  ;;  %5630 = vmatpush3.bf16.msra.mxu1 %v7067_v10  ;;  %v7963_v10 = vand.u32 4294901760, %v7247_v1  ;;  %v7967_v32 = vand.u32 4294901760, %v7275_v41  ;;  %v2327_v49 = vand.u32 4294901760, %v7295_v38 }
 0x39c   :  { %5601 = vmatprep.subr.bf16.mxu0 %v7996_v47  ;;  %5631 = vmatprep.subr.bf16.mxu1 %v7996_v47 }
 0x39d   :  { %v2426_v55 = vsub.f32 %v7247_v1, %v7963_v10  ;;  %v7328_v10 = vld [vmem:[#allocation8 + $0x160] sm:$0xff]  ;;  %v2433_v35 = vsub.f32 %v7275_v41, %v7967_v32  ;;  %v7344_v33 = vsub.f32 %v7295_v38, %v2327_v49  ;;  %v7359_v32 = vld [vmem:[#allocation8 + $0x170] sm:$0xff]  ;;  %v7472_v53 = vpack.c.bf16 %v2330_v9, %v2327_v49 }
 0x39e   :  { %v5698_v49 = vpack.c.bf16 %v7317_v34, %v7312_v60 }
 0x39f   :  { %5603 = vmatpush3.bf16.msra.mxu0 %v5602_v5  ;;  %5633 = vmatpush3.bf16.msra.mxu1 %v7072_v29  ;;  %v2419_v29 = vsub.f32 %v7242_v12, %v7964_v22  ;;  %v8069_v5 = vand.u32 4294901760, %v7014_v7  ;;  %v7330_v22 = vld [vmem:[#allocation8 + $0x168] sm:$0xff]  ;;  %v2440_v7 = vsub.f32 %v7280_v45, %v7966_v4  ;;  %v2460_v0 = vand.u32 4294901760, %v7344_v33 }
 0x3a0   :  { %5604 = vmatprep.subr.bf16.mxu0 %v7996_v47  ;;  %5634 = vmatprep.subr.bf16.mxu1 %v7996_v47  ;;  %v2336_v4 = vand.u32 4294901760, %v7330_v22  ;;  %v5701_v9 = vpack.c.bf16 %v7349_v57, %v7344_v33 }
 0x3a1   :  { %v5608_v54 = vpack.c.bf16 %v8069_v5, %v8068_v17  ;;  %v2420_v8 = vand.u32 4294901760, %v2419_v29  ;;  %v8071_v29 = vand.u32 4294901760, %v7042_v62  ;;  %v5665_v17 = vpack.c.bf16 %v2413_v43, %v2406_v40 }
 0x3a2   :  { %v2333_v5 = vand.u32 4294901760, %v7328_v10  ;;  %v2454_v43 = vsub.f32 %v7317_v34, %v2453_v58  ;;  %v7387_v28 = vsub.f32 %v7330_v22, %v2336_v4 }
 0x3a3   :  { %5606 = vmatpush3.bf16.msra.mxu0 %v5605_v46  ;;  %5636 = vmatpush3.bf16.msra.mxu1 %v7077_v6  ;;  %v2427_v46 = vand.u32 4294901760, %v2426_v55  ;;  %v2446_v6 = vand.u32 4294901760, %v7312_v60  ;;  %v5611_v55 = vpack.c.bf16 %v8071_v29, %v8070_v21 }
 0x3a4   :  { %5607 = vmatprep.subr.bf16.mxu0 %v7996_v47  ;;  %5661 = vmatprep.subr.bf16.mxu1 %v7996_v47  ;;  %v7382_v20 = vsub.f32 %v7328_v10, %v2333_v5  ;;  %v2455_v29 = vand.u32 4294901760, %v2454_v43  ;;  %v2481_v44 = vand.u32 4294901760, %v7387_v28  ;;  %v7485_v23 = vpack.c.bf16 %v2336_v4, %v2333_v5 }
 0x3a5   :  { %v5668_v62 = vpack.c.bf16 %v2427_v46, %v2420_v8  ;;  %v2447_v40 = vsub.f32 %v7312_v60, %v2446_v6  ;;  %v2339_v8 = vand.u32 4294901760, %v7359_v32  ;;  %v2342_v46 = vand.u32 4294901760, %v7361_v13 }
 0x3a6   :  { %4783 = vmatmul.mubr.f32.vlgmr.msra.gmra.mrb[22].mxu1 %v7106_v24  ;;  %v2474_v42 = vand.u32 4294901760, %v7382_v20  ;;  %v2482_v43 = vsub.f32 %v7387_v28, %v2481_v44  ;;  %v5686_v10 = vpack.c.bf16 %v7208_v11, %v7203_v31  ;;  %v5695_v4 = vpack.c.bf16 %v7280_v45, %v7275_v41 }
 0x3a7   :  { %5609 = vmatpush3.bf16.msra.mxu0 %v5608_v54  ;;  %5663 = vmatpush3.bf16.msra.mxu1 %v5662_v56  ;;  %v2434_v54 = vand.u32 4294901760, %v2433_v35  ;;  %v2441_v56 = vand.u32 4294901760, %v2440_v7  ;;  %v7397_v35 = vpack.c.bf16 %v2306_v16, %v2303_v15  ;;  %v2448_v21 = vand.u32 4294901760, %v2447_v40 }
 0x3a8   :  { %5610 = vmatprep.subr.bf16.mxu0 %v7996_v47  ;;  %5664 = vmatprep.subr.bf16.mxu1 %v7996_v47  ;;  %v7417_v15 = vsub.f32 %v7361_v13, %v2342_v46  ;;  %v7427_v16 = vpack.c.bf16 %v2312_v26, %v2309_v48  ;;  %v2475_v40 = vsub.f32 %v7382_v20, %v2474_v42  ;;  %v8074_v31 = vand.u32 4294901760, %v7242_v12 }
 0x3a9   :  { %4852 = vmatprep.mubr.msk.f32.mxu1 %vm6108_vm1, %v7995_v59  ;;  %v5671_v7 = vpack.c.bf16 %v2441_v56, %v2434_v54  ;;  %v7444_v48 = vpack.c.bf16 %v2318_v19, %v2315_v61  ;;  %v5689_v13 = vpack.c.bf16 %v7235_v63, %v7230_v51  ;;  %v5704_v5 = vpack.c.bf16 %v7387_v28, %v7382_v20 }
 0x3aa   :  { %v2495_v50 = vand.u32 4294901760, %v7417_v15  ;;  %v8075_v11 = vand.u32 4294901760, %v7247_v1 }
 0x3ab   :  { %5612 = vmatpush3.bf16.msra.mxu0 %v5611_v55  ;;  %5666 = vmatpush3.bf16.msra.mxu1 %v5665_v17  ;;  %v2461_v55 = vsub.f32 %v7344_v33, %v2460_v0  ;;  %v2468_v17 = vsub.f32 %v7349_v57, %v2467_v36  ;;  %v2952_v57 = vld [vmem:[#allocation8 + $0x200] sm:$0xff] }
 0x3ac   :  { %5637 = vmatprep.subr.bf16.mxu0 %v7996_v47  ;;  %5667 = vmatprep.subr.bf16.mxu1 %v7996_v47 }
 0x3ad   :  { %v2462_v54 = vand.u32 4294901760, %v2461_v55  ;;  %v2469_v56 = vand.u32 4294901760, %v2468_v17  ;;  %v2496_v55 = vsub.f32 %v7417_v15, %v2495_v50  ;;  %v7463_v17 = vand.u32 4294901760, %v7102_v14 }
 0x3ae   :  { %4748 = vmatmul.mubr.f32.vlgmr.msra.gmra.mrb[10].mxu0 %v7106_v24  ;;  %v7412_v24 = vsub.f32 %v7359_v32, %v2339_v8  ;;  %v5692_v32 = vpack.c.bf16 %v7247_v1, %v7242_v12  ;;  %v5746_v12 = vpack.c.bf16 %v2453_v58, %v2446_v6  ;;  %v5749_v1 = vpack.c.bf16 %v2467_v36, %v2460_v0  ;;  %v2953_v0 = vld [vmem:[#allocation8 + $0x208] sm:$0xff] }
 0x3af   :  { %5639 = vmatpush3.bf16.msra.mxu0 %v7367_v3  ;;  %5669 = vmatpush3.bf16.msra.mxu1 %v5668_v62  ;;  %v5674_v62 = vpack.c.bf16 %v2455_v29, %v2448_v21  ;;  %v5677_v26 = vpack.c.bf16 %v2469_v56, %v2462_v54  ;;  %v2483_v21 = vand.u32 4294901760, %v2482_v43  ;;  %v2497_v19 = vand.u32 4294901760, %v2496_v55  ;;  %v2956_v43 = vld [vmem:[#allocation8 + $0x220] sm:$0xff] }
 0x3b0   :  { %5640 = vmatprep.subr.bf16.mxu0 %v7996_v47  ;;  %5670 = vmatprep.subr.bf16.mxu1 %v7996_v47  ;;  %v2488_v30 = vand.u32 4294901760, %v7412_v24  ;;  %v7476_v2 = vsub.f32 %v7102_v14, %v7463_v17  ;;  %v7497_v14 = vpack.c.bf16 %v2342_v46, %v2339_v8  ;;  %v5707_v8 = vpack.c.bf16 %v7417_v15, %v7412_v24 }
 0x3b1   :  { %4817 = vmatprep.mubr.msk.f32.mxu0 %vm6108_vm1, %v7995_v59  ;;  %v5734_v46 = vpack.c.bf16 %v2397_v39, %v2390_v27  ;;  %v5740_v27 = vpack.c.bf16 %v8075_v11, %v8074_v31  ;;  %v8076_v39 = vand.u32 4294901760, %v7275_v41  ;;  %v5752_v41 = vpack.c.bf16 %v2481_v44, %v2474_v42  ;;  %v2954_v44 = vld [vmem:[#allocation8 + $0x210] sm:$0xff]  ;;  %v2967_v11 = vld [vmem:[#allocation8 + $0x278] sm:$0xff] }
 0x3b2   :  { %v2489_v29 = vsub.f32 %v7412_v24, %v2488_v30  ;;  %v2379_v38 = vand.u32 4294901760, %v7476_v2  ;;  %v2974_v36 = vand.u32 4294901760, %v2952_v57  ;;  %v2977_v20 = vand.u32 4294901760, %v2953_v0  ;;  %v2955_v24 = vld [vmem:[#allocation8 + $0x218] sm:$0xff]  ;;  %v2966_v31 = vld [vmem:[#allocation8 + $0x270] sm:$0xff] }
 0x3b3   :  { %5642 = vmatpush3.bf16.msra.mxu0 %v7397_v35  ;;  %5672 = vmatpush3.bf16.msra.mxu1 %v5671_v7  ;;  %v2476_v7 = vand.u32 4294901760, %v2475_v40  ;;  %v2980_v15 = vand.u32 4294901760, %v2954_v44 }
 0x3b4   :  { %5643 = vmatprep.subr.bf16.mxu0 %v7996_v47  ;;  %5673 = vmatprep.subr.bf16.mxu1 %v7996_v47  ;;  %v2490_v61 = vand.u32 4294901760, %v2489_v29  ;;  %v2380_v22 = vsub.f32 %v7476_v2, %v2379_v38  ;;  %v7610_v28 = vpack.c.bf16 %v2977_v20, %v2974_v36  ;;  %v7614_v42 = vsub.f32 %v2953_v0, %v2977_v20 }
 0x3b5   :  { %v5680_v37 = vpack.c.bf16 %v2483_v21, %v2476_v7  ;;  %v2986_v7 = vand.u32 4294901760, %v2956_v43 }
 0x3b6   :  { %v5683_v25 = vpack.c.bf16 %v2497_v19, %v2490_v61  ;;  %v2381_v18 = vand.u32 4294901760, %v2380_v22  ;;  %v2959_v61 = vld [vmem:[#allocation8 + $0x238] sm:$0xff] }
 0x3b7   :  { %5645 = vmatpush3.bf16.msra.mxu0 %v7427_v16  ;;  %5675 = vmatpush3.bf16.msra.mxu1 %v5674_v62  ;;  %v8073_v62 = vand.u32 4294901760, %v7235_v63  ;;  %v7628_v55 = vsub.f32 %v2956_v43, %v2986_v7 }
 0x3b8   :  { %5646 = vmatprep.subr.bf16.mxu0 %v7996_v47  ;;  %5676 = vmatprep.subr.bf16.mxu1 %v7996_v47 }
 0x3bb   :  { %5648 = vmatpush3.bf16.msra.mxu0 %v7444_v48  ;;  %5678 = vmatpush3.bf16.msra.mxu1 %v5677_v26 }
 0x3bc   :  { %5649 = vmatprep.subr.bf16.mxu0 %v7996_v47  ;;  %5679 = vmatprep.subr.bf16.mxu1 %v7996_v47 }
 0x3bf   :  { %5651 = vmatpush3.bf16.msra.mxu0 %v7460_v52  ;;  %5681 = vmatpush3.bf16.msra.mxu1 %v5680_v37  ;;  %v2958_v37 = vld [vmem:[#allocation8 + $0x230] sm:$0xff] }
 0x3c0   :  { %5652 = vmatprep.subr.bf16.mxu0 %v7996_v47  ;;  %5682 = vmatprep.subr.bf16.mxu1 %v7996_v47  ;;  %v2992_v19 = vand.u32 4294901760, %v2958_v37 }
 0x3c3   :  { %5654 = vmatpush3.bf16.msra.mxu0 %v7472_v53  ;;  %5684 = vmatpush3.bf16.msra.mxu1 %v5683_v25 }
 0x3c4   :  { %5655 = vmatprep.subr.bf16.mxu0 %v7996_v47  ;;  %5709 = vmatprep.subr.bf16.mxu1 %v7996_v47 }
 0x3c6   :  { %4853 = vmatmul.mubr.f32.vlgmr.msra.gmra.mrb[24].mxu1 %v7463_v17 }
 0x3c7   :  { %5657 = vmatpush3.bf16.msra.mxu0 %v7485_v23  ;;  %5711 = vmatpush3.bf16.msra.mxu1 %v7367_v3 }
 0x3c8   :  { %5658 = vmatprep.subr.bf16.mxu0 %v7996_v47  ;;  %5712 = vmatprep.subr.bf16.mxu1 %v7996_v47 }
 0x3c9   :  { %4922 = vmatprep.mubr.msk.f32.mxu1 %vm6108_vm1, %v7995_v59 }
 0x3cb   :  { %5660 = vmatpush3.bf16.msra.mxu0 %v7497_v14  ;;  %5714 = vmatpush3.bf16.msra.mxu1 %v7397_v35 }
 0x3cc   :  { %5685 = vmatprep.subr.bf16.mxu0 %v7996_v47  ;;  %5715 = vmatprep.subr.bf16.mxu1 %v7996_v47 }
 0x3ce   :  { %4818 = vmatmul.mubr.f32.vlgmr.msra.gmra.mrb[12].mxu0 %v2381_v18 }
 0x3cf   :  { %5687 = vmatpush3.bf16.msra.mxu0 %v5686_v10  ;;  %5717 = vmatpush3.bf16.msra.mxu1 %v7427_v16 }
 0x3d0   :  { %5688 = vmatprep.subr.bf16.mxu0 %v7996_v47  ;;  %5718 = vmatprep.subr.bf16.mxu1 %v7996_v47 }
 0x3d1   :  { %4887 = vmatprep.mubr.msk.f32.mxu0 %vm6108_vm1, %v7995_v59 }
 0x3d3   :  { %5690 = vmatpush3.bf16.msra.mxu0 %v5689_v13  ;;  %5720 = vmatpush3.bf16.msra.mxu1 %v7444_v48 }
 0x3d4   :  { %5691 = vmatprep.subr.bf16.mxu0 %v7996_v47  ;;  %5721 = vmatprep.subr.bf16.mxu1 %v7996_v47 }
 0x3d7   :  { %5693 = vmatpush3.bf16.msra.mxu0 %v5692_v32  ;;  %5723 = vmatpush3.bf16.msra.mxu1 %v7460_v52  ;;  %v2962_v32 = vld [vmem:[#allocation8 + $0x250] sm:$0xff] }
 0x3d8   :  { %5694 = vmatprep.subr.bf16.mxu0 %v7996_v47  ;;  %5724 = vmatprep.subr.bf16.mxu1 %v7996_v47 }
 0x3db   :  { %5696 = vmatpush3.bf16.msra.mxu0 %v5695_v4  ;;  %5726 = vmatpush3.bf16.msra.mxu1 %v7472_v53  ;;  %v2963_v4 = vld [vmem:[#allocation8 + $0x258] sm:$0xff] }
 0x3dc   :  { %5697 = vmatprep.subr.bf16.mxu0 %v7996_v47  ;;  %5727 = vmatprep.subr.bf16.mxu1 %v7996_v47 }
 0x3df   :  { %5699 = vmatpush3.bf16.msra.mxu0 %v5698_v49  ;;  %5729 = vmatpush3.bf16.msra.mxu1 %v7485_v23  ;;  %v3004_v49 = vand.u32 4294901760, %v2962_v32 }
 0x3e0   :  { %5700 = vmatprep.subr.bf16.mxu0 %v7996_v47  ;;  %5730 = vmatprep.subr.bf16.mxu1 %v7996_v47 }
 0x3e3   :  { %5702 = vmatpush3.bf16.msra.mxu0 %v5701_v9  ;;  %5732 = vmatpush3.bf16.msra.mxu1 %v7497_v14  ;;  %v3007_v9 = vand.u32 4294901760, %v2963_v4 }
 0x3e4   :  { %5703 = vmatprep.subr.bf16.mxu0 %v7996_v47  ;;  %5757 = vmatprep.subr.bf16.mxu1 %v7996_v47 }
 0x3e6   :  { %4923 = vmatmul.mubr.f32.vlgmr.msra.gmra.mrb[26].mxu1 %v2379_v38 }
 0x3e7   :  { %5705 = vmatpush3.bf16.msra.mxu0 %v5704_v5  ;;  %5759 = vmatpush3.bf16.msra.mxu1 %v7367_v3  ;;  %v8072_v3 = vand.u32 4294901760, %v7230_v51  ;;  %v8077_v51 = vand.u32 4294901760, %v7280_v45  ;;  %v5755_v45 = vpack.c.bf16 %v2495_v50, %v2488_v30  ;;  %v2957_v30 = vld [vmem:[#allocation8 + $0x228] sm:$0xff]  ;;  %v7644_v5 = vpack.c.bf16 %v3007_v9, %v3004_v49 }
 0x3e8   :  { %5706 = vmatprep.subr.bf16.mxu0 %v7996_v47  ;;  %5760 = vmatprep.subr.bf16.mxu1 %v7996_v47  ;;  %v2989_v21 = vand.u32 4294901760, %v2957_v30 }
 0x3e9   :  { %4992 = vmatprep.mubr.msk.f32.mxu1 %vm6108_vm1, %v7995_v59  ;;  %v5737_v54 = vpack.c.bf16 %v8073_v62, %v8072_v3  ;;  %v5743_v63 = vpack.c.bf16 %v8077_v51, %v8076_v39 }
 0x3ea   :  { %v7626_v29 = vpack.c.bf16 %v2989_v21, %v2986_v7 }
 0x3eb   :  { %5708 = vmatpush3.bf16.msra.mxu0 %v5707_v8  ;;  %5762 = vmatpush3.bf16.msra.mxu1 %v7397_v35  ;;  %v7612_v35 = vsub.f32 %v2952_v57, %v2974_v36  ;;  %v2964_v8 = vld [vmem:[#allocation8 + $0x260] sm:$0xff] }
 0x3ec   :  { %5733 = vmatprep.subr.bf16.mxu0 %v7996_v47  ;;  %5763 = vmatprep.subr.bf16.mxu1 %v7996_v47  ;;  %v3010_v3 = vand.u32 4294901760, %v2964_v8 }
 0x3ee   :  { %4888 = vmatmul.mubr.f32.vlgmr.msra.gmra.mrb[14].mxu0 %v7476_v2  ;;  %v2960_v2 = vld [vmem:[#allocation8 + $0x240] sm:$0xff] }
 0x3ef   :  { %5735 = vmatpush3.bf16.msra.mxu0 %v5734_v46  ;;  %5765 = vmatpush3.bf16.msra.mxu1 %v7427_v16  ;;  %v2983_v16 = vand.u32 4294901760, %v2955_v24  ;;  %v2998_v22 = vand.u32 4294901760, %v2960_v2  ;;  %v2965_v46 = vld [vmem:[#allocation8 + $0x268] sm:$0xff] }
 0x3f0   :  { %5736 = vmatprep.subr.bf16.mxu0 %v7996_v47  ;;  %5766 = vmatprep.subr.bf16.mxu1 %v7996_v47  ;;  %v3013_v62 = vand.u32 4294901760, %v2965_v46 }
 0x3f1   :  { %4957 = vmatprep.mubr.msk.f32.mxu0 %vm6108_vm1, %v7995_v59  ;;  %v7618_v56 = vpack.c.bf16 %v2983_v16, %v2980_v15  ;;  %v7623_v26 = vsub.f32 %v2955_v24, %v2983_v16  ;;  %v7654_v51 = vsub.f32 %v2960_v2, %v2998_v22 }
 0x3f3   :  { %5738 = vmatpush3.bf16.msra.mxu0 %v5737_v54  ;;  %5768 = vmatpush3.bf16.msra.mxu1 %v7444_v48  ;;  %v7621_v48 = vsub.f32 %v2954_v44, %v2980_v15  ;;  %v7648_v54 = vpack.c.bf16 %v3013_v62, %v3010_v3  ;;  %v3088_v24 = vand.u32 4294901760, %v7623_v26 }
 0x3f4   :  { %5739 = vmatprep.subr.bf16.mxu0 %v7996_v47  ;;  %5769 = vmatprep.subr.bf16.mxu1 %v7996_v47 }
 0x3f5   :  { %v3081_v44 = vand.u32 4294901760, %v7621_v48  ;;  %v3089_v43 = vsub.f32 %v7623_v26, %v3088_v24 }
 0x3f7   :  { %5741 = vmatpush3.bf16.msra.mxu0 %v5740_v27  ;;  %5771 = vmatpush3.bf16.msra.mxu1 %v7460_v52  ;;  %v7630_v52 = vsub.f32 %v2957_v30, %v2989_v21  ;;  %v7650_v27 = vsub.f32 %v2958_v37, %v2992_v19  ;;  %v3090_v7 = vand.u32 4294901760, %v3089_v43  ;;  %v7980_v21 = vand.u32 4294901760, %v7628_v55 }
 0x3f8   :  { %5742 = vmatprep.subr.bf16.mxu0 %v7996_v47  ;;  %5772 = vmatprep.subr.bf16.mxu1 %v7996_v47 }
 0x3f9   :  { %v7979_v37 = vand.u32 4294901760, %v7630_v52 }
 0x3fb   :  { %5744 = vmatpush3.bf16.msra.mxu0 %v5743_v63  ;;  %5774 = vmatpush3.bf16.msra.mxu1 %v7472_v53  ;;  %v3103_v2 = vsub.f32 %v7630_v52, %v7979_v37 }
 0x3fc   :  { %5745 = vmatprep.subr.bf16.mxu0 %v7996_v47  ;;  %5775 = vmatprep.subr.bf16.mxu1 %v7996_v47 }
 0x3ff   :  { %5747 = vmatpush3.bf16.msra.mxu0 %v5746_v12  ;;  %5777 = vmatpush3.bf16.msra.mxu1 %v7485_v23  ;;  %v2961_v23 = vld [vmem:[#allocation8 + $0x248] sm:$0xff]  ;;  %v7659_v12 = vsub.f32 %v2962_v32, %v3004_v49 }
 0x400   :  { %5748 = vmatprep.subr.bf16.mxu0 %v7996_v47  ;;  %5778 = vmatprep.subr.bf16.mxu1 %v7996_v47  ;;  %v3001_v10 = vand.u32 4294901760, %v2961_v23 }
 0x402   :  { %v7640_v13 = vpack.c.bf16 %v3001_v10, %v2998_v22  ;;  %v7656_v63 = vsub.f32 %v2961_v23, %v3001_v10  ;;  %v3104_v22 = vand.u32 4294901760, %v3103_v2 }
 0x403   :  { %5750 = vmatpush3.bf16.msra.mxu0 %v5749_v1  ;;  %5780 = vmatpush3.bf16.msra.mxu1 %v7497_v14  ;;  %v7661_v1 = vsub.f32 %v2963_v4, %v3007_v9 }
 0x404   :  { %5751 = vmatprep.subr.bf16.mxu0 %v7996_v47 }
 0x406   :  { %4993 = vmatmul.mubr.f32.vlgmr.msra.gmra.mrb[28].mxu1 %v7463_v17 }
 0x407   :  { %5753 = vmatpush3.bf16.msra.mxu0 %v5752_v41  ;;  %v7663_v41 = vsub.f32 %v2964_v8, %v3010_v3  ;;  %v7976_v8 = vand.u32 4294901760, %v7654_v51 }
 0x408   :  { %5754 = vmatprep.subr.bf16.mxu0 %v7996_v47 }
 0x40b   :  { %5756 = vmatpush3.bf16.msra.mxu0 %v5755_v45  ;;  %v7665_v45 = vsub.f32 %v2965_v46, %v3013_v62  ;;  %v7975_v46 = vand.u32 4294901760, %v7656_v63 }
 0x40c   :  { %5781 = vmatprep.subr.bf16.mxu0 %v7996_v47 }
 0x40d   :  { %v7971_v2 = vand.u32 4294901760, %v7665_v45 }
 0x40e   :  { %4958 = vmatmul.mubr.f32.vlgmr.msra.gmra.mrb[16].mxu0 %v7463_v17  ;;  %v2995_v17 = vand.u32 4294901760, %v2959_v61 }
 0x40f   :  { %5027 = vmatprep.mubr.msk.f32.mxu0 %vm6108_vm1, %v7995_v59  ;;  %5783 = vmatpush3.bf16.msra.mxu0 %v7610_v28 }
 0x410   :  { %5784 = vmatprep.subr.bf16.mxu0 %v7996_v47  ;;  %v7634_v53 = vpack.c.bf16 %v2995_v17, %v2992_v19  ;;  %v7652_v39 = vsub.f32 %v2959_v61, %v2995_v17  ;;  %v3096_v17 = vsub.f32 %v7628_v55, %v7980_v21 }
 0x412   :  { %v3097_v23 = vand.u32 4294901760, %v3096_v17 }
 0x413   :  { %5786 = vmatpush3.bf16.msra.mxu0 %v7618_v56 }
 0x414   :  { %5787 = vmatprep.subr.bf16.mxu0 %v7996_v47  ;;  %v7712_v4 = vpack.c.bf16 %v3104_v22, %v3097_v23  ;;  %v3159_v22 = vsub.f32 %v7665_v45, %v7971_v2 }
 0x417   :  { %5789 = vmatpush3.bf16.msra.mxu0 %v7626_v29 }
 0x418   :  { %5790 = vmatprep.subr.bf16.mxu0 %v7996_v47 }
 0x41b   :  { %5792 = vmatpush3.bf16.msra.mxu0 %v7634_v53 }
 0x41c   :  { %5793 = vmatprep.subr.bf16.mxu0 %v7996_v47 }
 0x41f   :  { %5795 = vmatpush3.bf16.msra.mxu0 %v7640_v13 }
 0x420   :  { %5796 = vmatprep.subr.bf16.mxu0 %v7996_v47 }
 0x423   :  { %5798 = vmatpush3.bf16.msra.mxu0 %v7644_v5 }
 0x424   :  { %5799 = vmatprep.subr.bf16.mxu0 %v7996_v47 }
 0x427   :  { %5801 = vmatpush3.bf16.msra.mxu0 %v7648_v54 }
 0x428   :  { %5802 = vmatprep.subr.bf16.mxu0 %v7996_v47 }
 0x439   :  { %v1893_v60 = vpop.f32.mrb[18].mxu1 }
 0x43a   :  { %v4644_v34 = vpop.f32.mrb[19].mxu1 }
 0x43b   :  { %v3019_v34 = vand.u32 4294901760, %v2967_v11 }
 0x43d   :  { %v7674_v0 = vsub.f32 %v2967_v11, %v3019_v34  ;;  %v3131_v11 = vsub.f32 %v7656_v63, %v7975_v46 }
 0x441   :  { %v1742_v6 = vpop.f32.mrb[6].mxu0 }
 0x442   :  { %v1894_v58 = vadd.f32 %v1893_v60, %v1742_v6  ;;  %v4609_v33 = vpop.f32.mrb[7].mxu0  ;;  %v3016_v60 = vand.u32 4294901760, %v2966_v31  ;;  %v3067_v6 = vand.u32 4294901760, %v7612_v35 }
 0x444   :  { %v7670_v33 = vpack.c.bf16 %v3019_v34, %v3016_v60  ;;  %v7672_v57 = vsub.f32 %v2966_v31, %v3016_v60  ;;  %v3068_v36 = vsub.f32 %v7612_v35, %v3067_v6  ;;  %v3124_v31 = vsub.f32 %v7654_v51, %v7976_v8 }
 0x446   :  { %5804 = vmatpush3.bf16.msra.mxu0 %v7670_v33  ;;  %v3069_v15 = vand.u32 4294901760, %v3068_v36  ;;  %v3125_v36 = vand.u32 4294901760, %v3124_v31 }
 0x447   :  { %5805 = vmatprep.subr.bf16.mxu0 %v7996_v47 }
 0x459   :  { %v2086_v40 = vpop.f32.mrb[20].mxu1 }
 0x45a   :  { %v4714_v50 = vpop.f32.mrb[21].mxu1 }
 0x461   :  { %v1997_v25 = vpop.f32.mrb[8].mxu0 }
 0x462   :  { %v1998_v38 = vadd.f32 %v1997_v25, %v1894_v58  ;;  %v4679_v14 = vpop.f32.mrb[9].mxu0  ;;  %v3074_v58 = vand.u32 4294901760, %v7614_v42 }
 0x463   :  { %v7977_v14 = vand.u32 4294901760, %v7652_v39 }
 0x464   :  { %v7638_v18 = vadd.f32 %v2086_v40, %v1998_v38  ;;  %v3075_v20 = vsub.f32 %v7614_v42, %v3074_v58  ;;  %v3082_v40 = vsub.f32 %v7621_v48, %v3081_v44  ;;  %v7978_v38 = vand.u32 4294901760, %v7650_v27 }
 0x465   :  { %v3117_v32 = vsub.f32 %v7652_v39, %v7977_v14 }
 0x466   :  { %v3076_v16 = vand.u32 4294901760, %v3075_v20  ;;  %v3083_v50 = vand.u32 4294901760, %v3082_v40  ;;  %v3110_v10 = vsub.f32 %v7650_v27, %v7978_v38  ;;  %v3132_v20 = vand.u32 4294901760, %v3131_v11 }
 0x467   :  { %v3118_v9 = vand.u32 4294901760, %v3117_v32  ;;  %v3160_v32 = vand.u32 4294901760, %v3159_v22 }
 0x468   :  { %v7692_v30 = vpack.c.bf16 %v3076_v16, %v3069_v15  ;;  %v7696_v19 = vpack.c.bf16 %v3090_v7, %v3083_v50  ;;  %v3111_v49 = vand.u32 4294901760, %v3110_v10  ;;  %v7974_v15 = vand.u32 4294901760, %v7659_v12 }
 0x469   :  { %v7973_v16 = vand.u32 4294901760, %v7661_v1  ;;  %v7727_v43 = vpack.c.bf16 %v3132_v20, %v3125_v36  ;;  %v5830_v20 = vpack.c.bf16 %v7614_v42, %v7612_v35  ;;  %v8078_v35 = vand.u32 4294901760, %v7628_v55 }
 0x46a   :  { %v7716_v62 = vpack.c.bf16 %v3118_v9, %v3111_v49  ;;  %v3138_v50 = vsub.f32 %v7659_v12, %v7974_v15  ;;  %v7970_v49 = vand.u32 4294901760, %v7672_v57  ;;  %v7969_v9 = vand.u32 4294901760, %v7674_v0 }
 0x46b   :  { %v3145_v7 = vsub.f32 %v7661_v1, %v7973_v16  ;;  %v8079_v42 = vand.u32 4294901760, %v7630_v52 }
 0x46c   :  { %v3139_v17 = vand.u32 4294901760, %v3138_v50  ;;  %v3166_v31 = vsub.f32 %v7672_v57, %v7970_v49  ;;  %v3173_v11 = vsub.f32 %v7674_v0, %v7969_v9  ;;  %v5833_v50 = vpack.c.bf16 %v7623_v26, %v7621_v48 }
 0x46d   :  { %v8081_v48 = vand.u32 4294901760, %v7652_v39 }
 0x479   :  { %v2292_v61 = vpop.f32.mrb[22].mxu1 }
 0x47a   :  { %v4784_v25 = vpop.f32.mrb[23].mxu1 }
 0x47b   :  { %v7972_v25 = vand.u32 4294901760, %v7663_v41 }
 0x481   :  { %v2205_v3 = vpop.f32.mrb[10].mxu0 }
 0x482   :  { %v2206_v60 = vadd.f32 %v2205_v3, %v7638_v18  ;;  %v4749_v34 = vpop.f32.mrb[11].mxu0  ;;  %v3146_v18 = vand.u32 4294901760, %v3145_v7 }
 0x483   :  { %v3174_v34 = vand.u32 4294901760, %v3173_v11  ;;  %v5842_v11 = vpack.c.bf16 %v7656_v63, %v7654_v51 }
 0x484   :  { %v2293_v40 = vadd.f32 %v2292_v61, %v2206_v60  ;;  %v5821_v23 = vpack.c.bf16 %v3146_v18, %v3139_v17  ;;  %v3152_v61 = vsub.f32 %v7663_v41, %v7972_v25  ;;  %v3167_v60 = vand.u32 4294901760, %v3166_v31 }
 0x485   :  { %v5836_v18 = vpack.c.bf16 %v7630_v52, %v7628_v55  ;;  %v8084_v55 = vand.u32 4294901760, %v7659_v12  ;;  %v8085_v52 = vand.u32 4294901760, %v7661_v1 }
 0x486   :  { %v3153_v10 = vand.u32 4294901760, %v3152_v61  ;;  %v5827_v36 = vpack.c.bf16 %v3174_v34, %v3167_v60  ;;  %v5839_v61 = vpack.c.bf16 %v7652_v39, %v7650_v27  ;;  %v5845_v60 = vpack.c.bf16 %v7661_v1, %v7659_v12 }
 0x487   :  { %v5848_v34 = vpack.c.bf16 %v7665_v45, %v7663_v41  ;;  %v8087_v39 = vand.u32 4294901760, %v7665_v45 }
 0x488   :  { %v5824_v3 = vpack.c.bf16 %v3160_v32, %v3153_v10 }
 0x499   :  { %v2534_v7 = vpop.f32.mrb[24].mxu1 }
 0x49a   :  { %v4854_v17 = vpop.f32.mrb[25].mxu1 }
 0x49b   :  { %v5851_v17 = vpack.c.bf16 %v7674_v0, %v7672_v57 }
 0x4a1   :  { %v2383_v22 = vpop.f32.mrb[12].mxu0 }
 0x4a2   :  { %v2384_v10 = vadd.f32 %v2383_v22, %v2293_v40  ;;  %v4819_v32 = vpop.f32.mrb[13].mxu0 }
 0x4a3   :  { %v1615_v32 = vpop.xlane.xlu1 %1614 }
 0x4a4   :  { %v2535_v31 = vadd.f32 %v2534_v7, %v2384_v10  ;;  %v3642_v10 = vld [vmem:[%s7900_s4 + $0x2] ss:$0 sm:$0xff] }
 0x4a5   :  { %v2942_v14 = vmul.f32 %v3642_v10, %v1615_v32 }
 0x4b9   :  { %v2727_v9 = vpop.f32.mrb[26].mxu1 }
 0x4ba   :  { %v4924_v49 = vpop.f32.mrb[27].mxu1 }
 0x4bb   :  { %v3643_v49 = vld [vmem:[%s7900_s4 + $0x3] ss:$0 sm:$0xff] }
 0x4c1   :  { %v2638_v2 = vpop.f32.mrb[14].mxu0 }
 0x4c2   :  { %v2639_v25 = vadd.f32 %v2638_v2, %v2535_v31  ;;  %v4889_v16 = vpop.f32.mrb[15].mxu0 }
 0x4c4   :  { %v2728_v40 = vadd.f32 %v2727_v9, %v2639_v25 }
 0x4d9   :  { %v2933_v22 = vpop.f32.mrb[28].mxu1 }
 0x4da   :  { %v4994_v7 = vpop.f32.mrb[29].mxu1 }
 0x4e1   :  { %v2846_v15 = vpop.f32.mrb[16].mxu0 }
 0x4e2   :  { %v2847_v46 = vadd.f32 %v2846_v15, %v2728_v40  ;;  %v4959_v8 = vpop.f32.mrb[17].mxu0 }
 0x4e4   :  { %v2934_v38 = vadd.f32 %v2933_v22, %v2847_v46 }
 0x4e6   :  { %v2943_v37 = vadd.f32 %v2942_v14, %v2934_v38 }
 0x4e8   :  { %v2949_v2 = vadd.f32 %v3643_v49, %v2943_v37 }
 0x4ea   :  { %v2950_v16 = vmax.f32 %v2949_v2, 0.0 }
 0x4ec   :  { %v7773_v25 = vand.u32 4294901760, %v2950_v16 }
 0x4ee   :  { %v3055_v9 = vsub.f32 %v2950_v16, %v7773_v25 }
 0x4f0   :  { %v3056_v31 = vand.u32 4294901760, %v3055_v9 }
 0x4f2   :  { %v3057_v7 = vsub.f32 %v3055_v9, %v3056_v31 }
 0x4f4   :  { %v3058_v21 = vand.u32 4294901760, %v3057_v7 }
 0x4f6   :  { %5028 = vmatmul.mubr.f32.vlgmr.msra.gmra.mrb[18].mxu0 %v3058_v21  ;;  %v5881_v21 = vpack.c.bf16 %v3088_v24, %v3081_v44  ;;  %v8082_v44 = vand.u32 4294901760, %v7654_v51  ;;  %v8083_v24 = vand.u32 4294901760, %v7656_v63  ;;  %v8088_v51 = vand.u32 4294901760, %v7672_v57 }
 0x4f7   :  { %5807 = vmatpush3.bf16.msra.mxu0 %v7692_v30  ;;  %5062 = vmatprep.mubr.msk.f32.mxu0 %vm6108_vm1, %v7995_v59  ;;  %v5878_v30 = vpack.c.bf16 %v3074_v58, %v3067_v6  ;;  %v5884_v6 = vpack.c.bf16 %v8079_v42, %v8078_v35  ;;  %v8080_v58 = vand.u32 4294901760, %v7650_v27  ;;  %v8086_v27 = vand.u32 4294901760, %v7663_v41 }
 0x4f8   :  { %5808 = vmatprep.subr.bf16.mxu0 %v7996_v47  ;;  %v5890_v37 = vpack.c.bf16 %v8083_v24, %v8082_v44  ;;  %v8089_v63 = vand.u32 4294901760, %v7674_v0 }
 0x4f9   :  { %v5887_v26 = vpack.c.bf16 %v8081_v48, %v8080_v58  ;;  %v5896_v38 = vpack.c.bf16 %v8087_v39, %v8086_v27 }
 0x4fa   :  { %v5899_v14 = vpack.c.bf16 %v8089_v63, %v8088_v51 }
 0x4fb   :  { %5810 = vmatpush3.bf16.msra.mxu0 %v7696_v19  ;;  %v5893_v19 = vpack.c.bf16 %v8085_v52, %v8084_v55 }
 0x4fc   :  { %5811 = vmatprep.subr.bf16.mxu0 %v7996_v47 }
 0x4ff   :  { %5813 = vmatpush3.bf16.msra.mxu0 %v7712_v4 }
 0x500   :  { %5814 = vmatprep.subr.bf16.mxu0 %v7996_v47 }
 0x503   :  { %5816 = vmatpush3.bf16.msra.mxu0 %v7716_v62 }
 0x504   :  { %5817 = vmatprep.subr.bf16.mxu0 %v7996_v47 }
 0x507   :  { %5819 = vmatpush3.bf16.msra.mxu0 %v7727_v43 }
 0x508   :  { %5820 = vmatprep.subr.bf16.mxu0 %v7996_v47 }
 0x50b   :  { %5822 = vmatpush3.bf16.msra.mxu0 %v5821_v23 }
 0x50c   :  { %5823 = vmatprep.subr.bf16.mxu0 %v7996_v47 }
 0x50f   :  { %5825 = vmatpush3.bf16.msra.mxu0 %v5824_v3 }
 0x510   :  { %5826 = vmatprep.subr.bf16.mxu0 %v7996_v47 }
 0x513   :  { %5828 = vmatpush3.bf16.msra.mxu0 %v5827_v36 }
 0x514   :  { %5829 = vmatprep.subr.bf16.mxu0 %v7996_v47 }
 0x516   :  { %5063 = vmatmul.mubr.f32.vlgmr.msra.gmra.mrb[18].mxu0 %v7773_v25 }
 0x517   :  { %5831 = vmatpush3.bf16.msra.mxu0 %v5830_v20  ;;  %5097 = vmatprep.mubr.msk.f32.mxu0 %vm6108_vm1, %v7995_v59 }
 0x518   :  { %5832 = vmatprep.subr.bf16.mxu0 %v7996_v47 }
 0x51b   :  { %5834 = vmatpush3.bf16.msra.mxu0 %v5833_v50 }
 0x51c   :  { %5835 = vmatprep.subr.bf16.mxu0 %v7996_v47 }
 0x51f   :  { %5837 = vmatpush3.bf16.msra.mxu0 %v5836_v18 }
 0x520   :  { %5838 = vmatprep.subr.bf16.mxu0 %v7996_v47 }
 0x523   :  { %5840 = vmatpush3.bf16.msra.mxu0 %v5839_v61 }
 0x524   :  { %5841 = vmatprep.subr.bf16.mxu0 %v7996_v47 }
 0x527   :  { %5843 = vmatpush3.bf16.msra.mxu0 %v5842_v11 }
 0x528   :  { %5844 = vmatprep.subr.bf16.mxu0 %v7996_v47 }
 0x52b   :  { %5846 = vmatpush3.bf16.msra.mxu0 %v5845_v60 }
 0x52c   :  { %5847 = vmatprep.subr.bf16.mxu0 %v7996_v47 }
 0x52f   :  { %5849 = vmatpush3.bf16.msra.mxu0 %v5848_v34 }
 0x530   :  { %5850 = vmatprep.subr.bf16.mxu0 %v7996_v47 }
 0x533   :  { %5852 = vmatpush3.bf16.msra.mxu0 %v5851_v17 }
 0x534   :  { %5853 = vmatprep.subr.bf16.mxu0 %v7996_v47 }
 0x536   :  { %5098 = vmatmul.mubr.f32.vlgmr.msra.gmra.mrb[18].mxu0 %v3055_v9 }
 0x537   :  { %5855 = vmatpush3.bf16.msra.mxu0 %v7610_v28  ;;  %5132 = vmatprep.mubr.msk.f32.mxu0 %vm6108_vm1, %v7995_v59 }
 0x538   :  { %5856 = vmatprep.subr.bf16.mxu0 %v7996_v47 }
 0x53b   :  { %5858 = vmatpush3.bf16.msra.mxu0 %v7618_v56 }
 0x53c   :  { %5859 = vmatprep.subr.bf16.mxu0 %v7996_v47 }
 0x53f   :  { %5861 = vmatpush3.bf16.msra.mxu0 %v7626_v29 }
 0x540   :  { %5862 = vmatprep.subr.bf16.mxu0 %v7996_v47 }
 0x543   :  { %5864 = vmatpush3.bf16.msra.mxu0 %v7634_v53 }
 0x544   :  { %5865 = vmatprep.subr.bf16.mxu0 %v7996_v47 }
 0x547   :  { %5867 = vmatpush3.bf16.msra.mxu0 %v7640_v13 }
 0x548   :  { %5868 = vmatprep.subr.bf16.mxu0 %v7996_v47 }
 0x54b   :  { %5870 = vmatpush3.bf16.msra.mxu0 %v7644_v5 }
 0x54c   :  { %5871 = vmatprep.subr.bf16.mxu0 %v7996_v47 }
 0x54f   :  { %5873 = vmatpush3.bf16.msra.mxu0 %v7648_v54 }
 0x550   :  { %5874 = vmatprep.subr.bf16.mxu0 %v7996_v47 }
 0x553   :  { %5876 = vmatpush3.bf16.msra.mxu0 %v7670_v33 }
 0x554   :  { %5877 = vmatprep.subr.bf16.mxu0 %v7996_v47 }
 0x556   :  { %5133 = vmatmul.mubr.f32.vlgmr.msra.gmra.mrb[18].mxu0 %v3056_v31 }
 0x557   :  { %5879 = vmatpush3.bf16.msra.mxu0 %v5878_v30  ;;  %5167 = vmatprep.mubr.msk.f32.mxu0 %vm6108_vm1, %v7995_v59 }
 0x558   :  { %5880 = vmatprep.subr.bf16.mxu0 %v7996_v47 }
 0x55b   :  { %5882 = vmatpush3.bf16.msra.mxu0 %v5881_v21 }
 0x55c   :  { %5883 = vmatprep.subr.bf16.mxu0 %v7996_v47 }
 0x55f   :  { %5885 = vmatpush3.bf16.msra.mxu0 %v5884_v6 }
 0x560   :  { %5886 = vmatprep.subr.bf16.mxu0 %v7996_v47 }
 0x563   :  { %5888 = vmatpush3.bf16.msra.mxu0 %v5887_v26 }
 0x564   :  { %5889 = vmatprep.subr.bf16.mxu0 %v7996_v47 }
 0x567   :  { %5891 = vmatpush3.bf16.msra.mxu0 %v5890_v37 }
 0x568   :  { %5892 = vmatprep.subr.bf16.mxu0 %v7996_v47 }
 0x56b   :  { %5894 = vmatpush3.bf16.msra.mxu0 %v5893_v19 }
 0x56c   :  { %5895 = vmatprep.subr.bf16.mxu0 %v7996_v47 }
 0x56f   :  { %5897 = vmatpush3.bf16.msra.mxu0 %v5896_v38 }
 0x570   :  { %5898 = vmatprep.subr.bf16.mxu0 %v7996_v47 }
 0x573   :  { %5900 = vmatpush3.bf16.msra.mxu0 %v5899_v14 }
 0x574   :  { %5901 = vmatprep.subr.bf16.mxu0 %v7996_v47 }
 0x576   :  { %5168 = vmatmul.mubr.f32.vlgmr.msra.gmra.mrb[18].mxu0 %v7773_v25 }
 0x577   :  { %5903 = vmatpush3.bf16.msra.mxu0 %v7610_v28  ;;  %5202 = vmatprep.mubr.msk.f32.mxu0 %vm6108_vm1, %v7995_v59  ;;  %v3644_v59 = vld [vmem:[%s7900_s4 + $0x4] ss:$0 sm:$0xff] }
 0x578   :  { %5904 = vmatprep.subr.bf16.mxu0 %v7996_v47 }
 0x57b   :  { %5906 = vmatpush3.bf16.msra.mxu0 %v7618_v56 }
 0x57c   :  { %5907 = vmatprep.subr.bf16.mxu0 %v7996_v47 }
 0x57f   :  { %5909 = vmatpush3.bf16.msra.mxu0 %v7626_v29 }
 0x580   :  { %5910 = vmatprep.subr.bf16.mxu0 %v7996_v47 }
 0x583   :  { %5912 = vmatpush3.bf16.msra.mxu0 %v7634_v53 }
 0x584   :  { %5913 = vmatprep.subr.bf16.mxu0 %v7996_v47 }
 0x587   :  { %5915 = vmatpush3.bf16.msra.mxu0 %v7640_v13 }
 0x588   :  { %5916 = vmatprep.subr.bf16.mxu0 %v7996_v47 }
 0x58b   :  { %5918 = vmatpush3.bf16.msra.mxu0 %v7644_v5 }
 0x58c   :  { %5919 = vmatprep.subr.bf16.mxu0 %v7996_v47 }
 0x58f   :  { %5921 = vmatpush3.bf16.msra.mxu0 %v7648_v54 }
 0x590   :  { %5922 = vmatprep.subr.bf16.mxu0 %v7996_v47 }
 0x593   :  { %5924 = vmatpush3.bf16.msra.mxu0 %v7670_v33 }
 0x596   :  { %5203 = vmatmul.mubr.f32.vlgmr.msra.gmra.mrb[18].mxu0 %v7773_v25 }
 0x669   :  { %v3610_v28 = vpop.f32.mrb[18].mxu0 }
 0x66a   :  { %v5925_v56 = vadd.f32 %v3644_v59, %v3610_v28  ;;  %v5204_v29 = vpop.f32.mrb[19].mxu0 }
 0x66c   :  { %v3614_v53 = vsub.f32 0.0, %v5925_v56 }
 0x66e   :  { %v3615_v13 = vmul.f32 1.442695, %v3614_v53 }
 0x670   :  { %5972 = vpow2.f32 %v3615_v13 }
 0x67a   :  { %v5973_v5 = vpop.eup %5972 }
 0x67b   :  { %v3617_v12 = vadd.f32 1.0, %v5973_v5 }
 0x67d   :  { %5974 = vrcp.f32 %v3617_v12 }
 0x687   :  { %v5975_v47 = vpop.eup %5974 }
 0x688   :  { %3620 = vst [vmem:[#allocation10] sm:$0x3] %v5975_v47 }
 0x689   :  { %6079 = shalt.err (!%p6076_p8)
}
 0x68a   :  { %s6080_s27 = scalar_lea.hbm %s7901_s5, 32 }
 0x68b   :  { %p6081_p9 = scmp.ne.s32.totalorder %s7901_s5, %s6080_s27  ;;  %p6084_p10 = scmp.lt.u32.totalorder %s6080_s27, %s7901_s5 }
 0x68d   :  { %p6086_p11 = pnand %p6084_p10, %p6081_p9 }
 0x68f   :  { %6089 = shalt.err (!%p6086_p11)
}
 0x690   :  { %3630 = dma.vmem_to_hbm [thread:$0]  %s3628_s24, 32, %s7901_s5, [#allocation4]  }
 0x691   :  { %6096 = dma.done.wait [#allocation4], 32  }
 0x692   :  { %6097 = vsyncadd [#allocation4], 4294967264 }
 0x693   :  { %3634 = vsyncpa [#allocation3], 1 }
 0x694   :  { %3635 = vsyncpa [#allocation6], 1 }
 0x695   :  { %3636 = vsyncpa [#allocation9], 1 }
 0x696   :  { %3637 = vsyncpa [#allocation4], 1 }

</bundles_post_ra>
